<compile_context>
chip_gen: v5e
topology: v5e:2x2
jax: 0.10.0
libtpu: 0.0.40
codegen_flags: <defaults>
</compile_context>

<pallas_src>
import math
import numpy as np
import jax
import jax.numpy as jnp
from jax.experimental import pallas as pl
from jax.experimental.pallas import tpu as pltpu

C8 = 8  # sublane tile: channels are zero-padded up to this for aligned slab stores


# ----------------------------------------------------------------------------
# shared layout helper: channel-pad + spatial zero-pad + flatten
# ----------------------------------------------------------------------------
def _pad_flat(x, pd, ph, pw):
    """(N, C, D, H, W) -> (N, C8, (D + 2*pd + 1) * Hp * Wp), zero padded.
    One extra zero depth plane is appended so every (junk-column) tap read in
    the conv kernel stays in bounds.  Returns (xf, (Hp, Wp))."""
    N, C, D, H, W = x.shape
    assert C <= C8
    xp = jnp.pad(x, ((0, 0), (0, C8 - C), (pd, pd + 1), (ph, ph), (pw, pw)))
    Hp, Wp = H + 2 * ph, W + 2 * pw
    return xp.reshape(N, C8, (D + 2 * pd + 1) * Hp * Wp), (Hp, Wp)


# ----------------------------------------------------------------------------
# 3D "same" convolution (stride 1, odd kernel, groups=1), flattened layout
# ----------------------------------------------------------------------------
def conv3d_flat(xf, out_dims, w, b):
    """xf: (N, C8, (D+2*pd+1)*F) from _pad_flat, F = Hp*Wp.
    w: (KD, KH, KW, Cin, Cout), Cin <= C8;  b: (Cout,).
    Returns (N, Cout, D*F): column d*F + h*Wp + w_ holds output voxel (d, h, w_);
    columns with h >= H or w_ >= W are junk and are ignored downstream."""
    D, H, W = out_dims
    N = xf.shape[0]
    KD, KH, KW, Cin, Cout = w.shape
    pd, ph, pw = (KD - 1) // 2, (KH - 1) // 2, (KW - 1) // 2
    Hp, Wp = H + 2 * ph, W + 2 * pw
    F = Hp * Wp
    DF = D * F
    taps = KD * KH * KW
    K2 = taps * C8
    assert xf.shape[1] == C8 and xf.shape[2] == (D + 2 * pd + 1) * F

    # weight columns follow the slab row order (row = tap*C8 + channel);
    # padded channels get zero weight columns.
    w_pad = jnp.pad(w, ((0, 0), (0, 0), (0, 0), (0, C8 - Cin), (0, 0)))
    w2 = jnp.transpose(w_pad.reshape(taps, C8, Cout), (2, 0, 1)).reshape(Cout, K2)
    b2 = b.reshape(Cout, 1)

    def kernel(xf_ref, w_ref, b_ref, o_ref, slab_ref):
        # Gather all taps into a (taps*C8, D*F) slab.  The per-depth output
        # column stride equals the padded-plane stride F, so each tap covers ALL
        # output depths with ONE contiguous lane slice; channel padding to C8
        # makes every slab write a full, aligned 8-sublane store.
        # TODO(synk): for much larger kernels, cap the static unroll with a
        #             fori_loop over kd (dynamic pl.ds offsets).
        for kd in range(KD):
            for kh in range(KH):
                for kw_ in range(KW):
                    t = (kd * KH + kh) * KW + kw_
                    src = kd * F + kh * Wp + kw_
                    slab_ref[pl.ds(t * C8, C8), :] = (
                        xf_ref[:, pl.ds(src, DF)].astype(jnp.float32))
        acc = jnp.dot(w_ref[...], slab_ref[...],
                      preferred_element_type=jnp.float32)   # ONE wide-K MXU dot
        o_ref[...] = (acc + b_ref[...]).astype(o_ref.dtype)

    # TODO(synk): at production D/H/W, tile the depth axis with a halo and raise
    #             vmem_limit_bytes so the resident block fits v7x's 64 MiB VMEM;
    #             at these test sizes everything is well under 1 MiB.
    return pl.pallas_call(
        kernel,
        out_shape=jax.ShapeDtypeStruct((N, Cout, DF), xf.dtype),
        grid=(N,),
        in_specs=[
            pl.BlockSpec((None, C8, xf.shape[2]), lambda n: (n, 0, 0)),
            pl.BlockSpec((Cout, K2), lambda n: (0, 0)),
            pl.BlockSpec((Cout, 1), lambda n: (0, 0)),
        ],
        out_specs=pl.BlockSpec((None, Cout, DF), lambda n: (n, 0, 0)),
        scratch_shapes=[pltpu.VMEM((K2, DF), jnp.float32)],
        compiler_params=pltpu.CompilerParams(dimension_semantics=("parallel",)),
    )(xf, w2, b2)


# ----------------------------------------------------------------------------
# AvgPool3d(2,2) + MaxPool3d(2,2)
# ----------------------------------------------------------------------------
def avg_plus_max_pool2(x):
    """(N, C, D, H, W) -> AvgPool3d(2,2) + MaxPool3d(2,2) = (N, C, D/2, H/2, W/2)."""
    N, C, D, H, W = x.shape
    Dd, Hd, Wd = D // 2, H // 2, W // 2
    L = C * Dd * Hd * Wd
    # host-side 2x2x2 window gather; the lane axis is the flattened
    # (C, Dd, Hd, Wd) output so the kernel's load/store are lane-dense.
    # TODO(synk): fold this gather into the kernel with strided ref reads.
    xr = x.reshape(N, C, Dd, 2, Hd, 2, Wd, 2)
    xr = xr.transpose(0, 3, 5, 7, 1, 2, 4, 6).reshape(N, 8, L)

    def kernel(x_ref, o_ref):
        v = x_ref[...]                                    # (8, L): the 8 window taps
        o_ref[...] = (jnp.max(v, axis=0, keepdims=True)
                      + 0.125 * jnp.sum(v, axis=0, keepdims=True)).astype(o_ref.dtype)

    out = pl.pallas_call(
        kernel,
        out_shape=jax.ShapeDtypeStruct((N, 1, L), x.dtype),
        grid=(N,),
        in_specs=[pl.BlockSpec((None, 8, L), lambda n: (n, 0, 0))],
        out_specs=pl.BlockSpec((None, 1, L), lambda n: (n, 0, 0)),
        compiler_params=pltpu.CompilerParams(dimension_semantics=("parallel",)),
    )(xr)
    return out.reshape(N, C, Dd, Hd, Wd)


# ----------------------------------------------------------------------------
# Trilinear x2 upsample + add + 1x1x1 conv + sigmoid + gating, fused
# ----------------------------------------------------------------------------
def _up2_matrix(n):
    """(2n, n) 1-D linear 2x upsample, align_corners=False (PyTorch default)."""
    m = np.zeros((2 * n, n), dtype=np.float32)
    for i in range(2 * n):
        c = (i + 0.5) / 2.0 - 0.5
        f = int(np.floor(c))
        t = c - f
        m[i, min(max(f, 0), n - 1)] += 1.0 - t
        m[i, min(max(f + 1, 0), n - 1)] += t
    return m


def _build_up_hw(H, Hd, W, Wd, Hp_g, Wp_g, Hp_l, Wp_l):
    """(F_g, F_l) bilinear H/W 2x-upsample matrix between the two flattened
    padded-plane layouts; junk rows/columns are exactly zero so padding junk
    never contributes."""
    # TODO(synk): for production H/W, replace this O(Hd*Wd*H*W) matrix with a
    #             separable / lerp+roll upsample to respect v7x's 64 MiB VMEM.
    uh = _up2_matrix(Hd)          # (H, Hd)
    uw = _up2_matrix(Wd)          # (W, Wd)
    m = np.zeros((Hp_g, Wp_g, Hp_l, Wp_l), np.float32)
    m[:Hd, :Wd, :H, :W] = np.einsum('ha,wb->abhw', uh, uw)
    return jnp.asarray(m.reshape(Hp_g * Wp_g, Hp_l * Wp_l))


def fused_attention(local_f, gf_f, xf_l, up_hw, lin_w, lin_b,
                    D, Dd, F_l, F_g, x_off):
    """sigmoid(Conv1x1(local + trilinear_up2(gf))) * x, fused over all depths.

    local_f: (N, C, D*F_l); gf_f: (N, C, Dd*F_g); xf_l: (N, C8, .) = the padded
    local-conv input (the original x is read back out of it at offset x_off);
    up_hw: (F_g, F_l); lin_w: (C, C); lin_b: (C,).  Returns (N, C, D*F_l)."""
    N, C, DFl = local_f.shape

    def kernel(loc_ref, gf_ref, xf_ref, up_ref, lw_ref, lb_ref, o_ref):
        xg = xf_ref[pl.ds(0, C), pl.ds(x_off, DFl)]   # original x, working layout
        loc = loc_ref[...]                            # (C, D*F_l)
        gf = gf_ref[...]                              # (C, Dd*F_g)
        up = up_ref[...]                              # (F_g, F_l)
        # trilinear x2 == in-kernel depth lerp (align_corners=False) + one small
        # shared bilinear H/W matrix applied per output depth.
        pieces = []
        for d in range(D):                            # static unroll, D is small
            f0 = (d - 1) // 2
            d0 = min(max(f0, 0), Dd - 1)
            d1 = min(max(f0 + 1, 0), Dd - 1)
            t = 0.75 - 0.5 * (d % 2)
            g = (1.0 - t) * gf[:, d0 * F_g:(d0 + 1) * F_g] \
                + t * gf[:, d1 * F_g:(d1 + 1) * F_g]
            pieces.append(jnp.dot(g, up, preferred_element_type=jnp.float32))
        z = loc + jnp.concatenate(pieces, axis=-1)    # (C, D*F_l)
        # 1x1x1 conv over the tiny channel dim: unrolled VPU broadcast-FMAs with
        # SMEM scalars (no (Cin,Cout,L) intermediate, no cross-sublane reduce).
        rows = []
        for co in range(C):
            acc = lw_ref[0, co] * z[0:1, :]
            for ci in range(1, C):
                acc = acc + lw_ref[ci, co] * z[ci:ci + 1, :]
            rows.append(acc + lb_ref[co])
        att = jax.nn.sigmoid(jnp.concatenate(rows, axis=0))
        o_ref[...] = (att * xg).astype(o_ref.dtype)

    return pl.pallas_call(
        kernel,
        out_shape=jax.ShapeDtypeStruct((N, C, DFl), local_f.dtype),
        grid=(N,),
        in_specs=[
            pl.BlockSpec((None, C, DFl), lambda n: (n, 0, 0)),           # local
            pl.BlockSpec((None, C, gf_f.shape[2]), lambda n: (n, 0, 0)), # global feat
            pl.BlockSpec((None, C8, xf_l.shape[2]), lambda n: (n, 0, 0)),# padded x (reused)
            pl.BlockSpec(up_hw.shape, lambda n: (0, 0)),                 # H/W upsample
            pl.BlockSpec(memory_space=pltpu.MemorySpace.SMEM),           # 1x1 weight
            pl.BlockSpec(memory_space=pltpu.MemorySpace.SMEM),           # 1x1 bias
        ],
        out_specs=pl.BlockSpec((None, C, DFl), lambda n: (n, 0, 0)),
        compiler_params=pltpu.CompilerParams(dimension_semantics=("parallel",)),
    )(local_f, gf_f, xf_l, up_hw, lin_w, lin_b)


# ----------------------------------------------------------------------------
# Attention_Block forward
# ----------------------------------------------------------------------------
def _fuse_global_weights(params):
    """Sum of four 'same' convs == one conv whose kernel is the sum of the
    center-aligned zero-padded kernels (exact by linearity)."""
    ws = [params["gh_w"], params["gw_w"], params["gd_w"], params["g3_w"]]
    bs = [params["gh_b"], params["gw_b"], params["gd_b"], params["g3_b"]]
    KD = max(w.shape[0] for w in ws)
    KH = max(w.shape[1] for w in ws)
    KW = max(w.shape[2] for w in ws)

    def pad_center(w):
        kd, kh, kw = w.shape[:3]
        return jnp.pad(w, (((KD - kd) // 2, (KD - kd) // 2),
                           ((KH - kh) // 2, (KH - kh) // 2),
                           ((KW - kw) // 2, (KW - kw) // 2),
                           (0, 0), (0, 0)))

    wg = pad_center(ws[0])
    for w in ws[1:]:
        wg = wg + pad_center(w)
    bg = bs[0] + bs[1] + bs[2] + bs[3]
    return wg, bg


def attention_block(x, params):
    """x: (N, C, D, H, W) -> attention * x, (N, C, D, H, W).  groups=1 path."""
    N, C, D, H, W = x.shape

    # ---- local branch: small_kernel^3 'same' conv ----
    sk = params["local_w"].shape[0]
    p_l = (sk - 1) // 2
    xf_l, (Hp_l, Wp_l) = _pad_flat(x, p_l, p_l, p_l)
    F_l = Hp_l * Wp_l
    local_f = conv3d_flat(xf_l, (D, H, W), params["local_w"], params["local_b"])

    # ---- global branch: (AvgPool + MaxPool), then ONE fused conv for all four ----
    x_d = avg_plus_max_pool2(x)                       # (N, C, Dd, Hd, Wd)
    Dd, Hd, Wd = D // 2, H // 2, W // 2
    wg, bg = _fuse_global_weights(params)
    p_g = (wg.shape[0] - 1) // 2
    xf_g, (Hp_g, Wp_g) = _pad_flat(x_d, p_g, p_g, p_g)
    F_g = Hp_g * Wp_g
    gf_f = conv3d_flat(xf_g, (Dd, Hd, Wd), wg, bg)    # (N, C, Dd*F_g)

    # ---- fused: trilinear up(x2) + add + 1x1x1 conv + sigmoid + gating ----
    up_hw = _build_up_hw(H, Hd, W, Wd, Hp_g, Wp_g, Hp_l, Wp_l)
    x_off = p_l * F_l + p_l * Wp_l + p_l              # where x[., d, h, w] sits in xf_l
    out_f = fused_attention(local_f, gf_f, xf_l, up_hw,
                            params["lin_w"], params["lin_b"],
                            D, Dd, F_l, F_g, x_off)
    # drop the padded-plane junk rows/columns; layout is already NCDHW.
    return out_f.reshape(N, C, D, Hp_l, Wp_l)[:, :, :, :H, :W]


if __name__ == "__main__":
    N, C, D, H, W = 2, 4, 8, 8, 8
    large_kernel, small_kernel = 5, 3

    key = jax.random.PRNGKey(0)
    keys = jax.random.split(key, 8)
    x = jax.random.normal(keys[0], (N, C, D, H, W), jnp.float32)   # PyTorch NCDHW input

    def conv_init(k, kd, kh, kw, cin, cout):
        k1, k2 = jax.random.split(k)
        bound = 1.0 / math.sqrt(cin * kd * kh * kw)
        w = jax.random.uniform(k1, (kd, kh, kw, cin, cout), jnp.float32, -bound, bound)
        b = jax.random.uniform(k2, (cout,), jnp.float32, -bound, bound)
        return w, b

    s, lk = small_kernel, large_kernel
    params = {}
    params["local_w"], params["local_b"] = conv_init(keys[1], s, s, s, C, C)    # Conv_Block(small)
    params["g3_w"],    params["g3_b"]    = conv_init(keys[2], 3, 3, 3, C, C)    # global_3x3
    params["gh_w"],    params["gh_b"]    = conv_init(keys[3], lk, s, s, C, C)   # H_Conv (L, s, s)
    params["gw_w"],    params["gw_b"]    = conv_init(keys[4], s, lk, s, C, C)   # W_Conv (s, L, s)
    params["gd_w"],    params["gd_b"]    = conv_init(keys[5], s, s, lk, C, C)   # D_Conv (s, s, L)
    lin_w, lin_b = conv_init(keys[6], 1, 1, 1, C, C)                            # Conv_1x1
    params["lin_w"] = lin_w.reshape(C, C)
    params["lin_b"] = lin_b

    out = attention_block(x, params)
    out = jax.block_until_ready(out)
    assert out.shape == (N, C, D, H, W), out.shape
    assert bool(jnp.all(jnp.isfinite(out)))
    print("KERNEL_OK")
</pallas_src>

<mosaic_0001>
module attributes {stable_mosaic.version = 11 : i64} {
  func.func @kernel(%arg0: i32, %arg1: memref<1x8x1100xf32, #tpu.memory_space<vmem>>, %arg2: memref<4x216xf32, #tpu.memory_space<vmem>>, %arg3: memref<4x1xf32, #tpu.memory_space<vmem>>, %arg4: memref<1x4x800xf32, #tpu.memory_space<vmem>>, %arg5: memref<216x800xf32, #tpu.memory_space<vmem>>) attributes {dimension_semantics = [#tpu.dimension_semantics<parallel>], iteration_bounds = array<i64: 2>, scalar_prefetch = 0 : i64, scratch_operands = 1 : i64, tpu.core_type = #tpu.core_type<tc>, window_params = [{transform_indices = @transform_0, window_bounds = array<i64: 1, 8, 1100>}, {pipeline_mode = #tpu.pipeline_mode<synchronous>, transform_indices = @transform_1, window_bounds = array<i64: 4, 216>}, {pipeline_mode = #tpu.pipeline_mode<synchronous>, transform_indices = @transform_2, window_bounds = array<i64: 4, 1>}, {transform_indices = @transform_3, window_bounds = array<i64: 1, 4, 800>}]} {
    %c0 = arith.constant 0 : index
    %c0_0 = arith.constant 0 : index
    %c0_1 = arith.constant 0 : index
    %0 = vector.load %arg1[%c0, %c0_0, %c0_1] : memref<1x8x1100xf32, #tpu.memory_space<vmem>>, vector<1x8x800xf32>
    %1 = vector.shape_cast %0 : vector<1x8x800xf32> to vector<8x800xf32>
    %c0_2 = arith.constant 0 : index
    %c0_3 = arith.constant 0 : index
    %2 = vector.load %arg5[%c0_2, %c0_3] : memref<216x800xf32, #tpu.memory_space<vmem>>, vector<8x800xf32>
    tpu.vector_store %arg5[%c0_2, %c0_3], %1 {strides = array<i32>} : memref<216x800xf32, #tpu.memory_space<vmem>>, vector<8x800xf32>,
    %c0_4 = arith.constant 0 : index
    %c0_5 = arith.constant 0 : index
    %c1 = arith.constant 1 : index
    %3 = vector.load %arg1[%c0_4, %c0_5, %c1] : memref<1x8x1100xf32, #tpu.memory_space<vmem>>, vector<1x8x800xf32>
    %4 = vector.shape_cast %3 : vector<1x8x800xf32> to vector<8x800xf32>
    %c8 = arith.constant 8 : index
    %c0_6 = arith.constant 0 : index
    %5 = vector.load %arg5[%c8, %c0_6] : memref<216x800xf32, #tpu.memory_space<vmem>>, vector<8x800xf32>
    tpu.vector_store %arg5[%c8, %c0_6], %4 {strides = array<i32>} : memref<216x800xf32, #tpu.memory_space<vmem>>, vector<8x800xf32>,
    %c0_7 = arith.constant 0 : index
    %c0_8 = arith.constant 0 : index
    %c2 = arith.constant 2 : index
    %6 = vector.load %arg1[%c0_7, %c0_8, %c2] : memref<1x8x1100xf32, #tpu.memory_space<vmem>>, vector<1x8x800xf32>
    %7 = vector.shape_cast %6 : vector<1x8x800xf32> to vector<8x800xf32>
    %c16 = arith.constant 16 : index
    %c0_9 = arith.constant 0 : index
    %8 = vector.load %arg5[%c16, %c0_9] : memref<216x800xf32, #tpu.memory_space<vmem>>, vector<8x800xf32>
    tpu.vector_store %arg5[%c16, %c0_9], %7 {strides = array<i32>} : memref<216x800xf32, #tpu.memory_space<vmem>>, vector<8x800xf32>,
    %c0_10 = arith.constant 0 : index
    %c0_11 = arith.constant 0 : index
    %c10 = arith.constant 10 : index
    %9 = vector.load %arg1[%c0_10, %c0_11, %c10] : memref<1x8x1100xf32, #tpu.memory_space<vmem>>, vector<1x8x800xf32>
    %10 = vector.shape_cast %9 : vector<1x8x800xf32> to vector<8x800xf32>
    %c24 = arith.constant 24 : index
    %c0_12 = arith.constant 0 : index
    %11 = vector.load %arg5[%c24, %c0_12] : memref<216x800xf32, #tpu.memory_space<vmem>>, vector<8x800xf32>
    tpu.vector_store %arg5[%c24, %c0_12], %10 {strides = array<i32>} : memref<216x800xf32, #tpu.memory_space<vmem>>, vector<8x800xf32>,
    %c0_13 = arith.constant 0 : index
    %c0_14 = arith.constant 0 : index
    %c11 = arith.constant 11 : index
    %12 = vector.load %arg1[%c0_13, %c0_14, %c11] : memref<1x8x1100xf32, #tpu.memory_space<vmem>>, vector<1x8x800xf32>
    %13 = vector.shape_cast %12 : vector<1x8x800xf32> to vector<8x800xf32>
    %c32 = arith.constant 32 : index
    %c0_15 = arith.constant 0 : index
    %14 = vector.load %arg5[%c32, %c0_15] : memref<216x800xf32, #tpu.memory_space<vmem>>, vector<8x800xf32>
    tpu.vector_store %arg5[%c32, %c0_15], %13 {strides = array<i32>} : memref<216x800xf32, #tpu.memory_space<vmem>>, vector<8x800xf32>,
    %c0_16 = arith.constant 0 : index
    %c0_17 = arith.constant 0 : index
    %c12 = arith.constant 12 : index
    %15 = vector.load %arg1[%c0_16, %c0_17, %c12] : memref<1x8x1100xf32, #tpu.memory_space<vmem>>, vector<1x8x800xf32>
    %16 = vector.shape_cast %15 : vector<1x8x800xf32> to vector<8x800xf32>
    %c40 = arith.constant 40 : index
    %c0_18 = arith.constant 0 : index
    %17 = vector.load %arg5[%c40, %c0_18] : memref<216x800xf32, #tpu.memory_space<vmem>>, vector<8x800xf32>
    tpu.vector_store %arg5[%c40, %c0_18], %16 {strides = array<i32>} : memref<216x800xf32, #tpu.memory_space<vmem>>, vector<8x800xf32>,
    %c0_19 = arith.constant 0 : index
    %c0_20 = arith.constant 0 : index
    %c20 = arith.constant 20 : index
    %18 = vector.load %arg1[%c0_19, %c0_20, %c20] : memref<1x8x1100xf32, #tpu.memory_space<vmem>>, vector<1x8x800xf32>
    %19 = vector.shape_cast %18 : vector<1x8x800xf32> to vector<8x800xf32>
    %c48 = arith.constant 48 : index
    %c0_21 = arith.constant 0 : index
    %20 = vector.load %arg5[%c48, %c0_21] : memref<216x800xf32, #tpu.memory_space<vmem>>, vector<8x800xf32>
    tpu.vector_store %arg5[%c48, %c0_21], %19 {strides = array<i32>} : memref<216x800xf32, #tpu.memory_space<vmem>>, vector<8x800xf32>,
    %c0_22 = arith.constant 0 : index
    %c0_23 = arith.constant 0 : index
    %c21 = arith.constant 21 : index
    %21 = vector.load %arg1[%c0_22, %c0_23, %c21] : memref<1x8x1100xf32, #tpu.memory_space<vmem>>, vector<1x8x800xf32>
    %22 = vector.shape_cast %21 : vector<1x8x800xf32> to vector<8x800xf32>
    %c56 = arith.constant 56 : index
    %c0_24 = arith.constant 0 : index
    %23 = vector.load %arg5[%c56, %c0_24] : memref<216x800xf32, #tpu.memory_space<vmem>>, vector<8x800xf32>
    tpu.vector_store %arg5[%c56, %c0_24], %22 {strides = array<i32>} : memref<216x800xf32, #tpu.memory_space<vmem>>, vector<8x800xf32>,
    %c0_25 = arith.constant 0 : index
    %c0_26 = arith.constant 0 : index
    %c22 = arith.constant 22 : index
    %24 = vector.load %arg1[%c0_25, %c0_26, %c22] : memref<1x8x1100xf32, #tpu.memory_space<vmem>>, vector<1x8x800xf32>
    %25 = vector.shape_cast %24 : vector<1x8x800xf32> to vector<8x800xf32>
    %c64 = arith.constant 64 : index
    %c0_27 = arith.constant 0 : index
    %26 = vector.load %arg5[%c64, %c0_27] : memref<216x800xf32, #tpu.memory_space<vmem>>, vector<8x800xf32>
    tpu.vector_store %arg5[%c64, %c0_27], %25 {strides = array<i32>} : memref<216x800xf32, #tpu.memory_space<vmem>>, vector<8x800xf32>,
    %c0_28 = arith.constant 0 : index
    %c0_29 = arith.constant 0 : index
    %c100 = arith.constant 100 : index
    %27 = vector.load %arg1[%c0_28, %c0_29, %c100] : memref<1x8x1100xf32, #tpu.memory_space<vmem>>, vector<1x8x800xf32>
    %28 = vector.shape_cast %27 : vector<1x8x800xf32> to vector<8x800xf32>
    %c72 = arith.constant 72 : index
    %c0_30 = arith.constant 0 : index
    %29 = vector.load %arg5[%c72, %c0_30] : memref<216x800xf32, #tpu.memory_space<vmem>>, vector<8x800xf32>
    tpu.vector_store %arg5[%c72, %c0_30], %28 {strides = array<i32>} : memref<216x800xf32, #tpu.memory_space<vmem>>, vector<8x800xf32>,
    %c0_31 = arith.constant 0 : index
    %c0_32 = arith.constant 0 : index
    %c101 = arith.constant 101 : index
    %30 = vector.load %arg1[%c0_31, %c0_32, %c101] : memref<1x8x1100xf32, #tpu.memory_space<vmem>>, vector<1x8x800xf32>
    %31 = vector.shape_cast %30 : vector<1x8x800xf32> to vector<8x800xf32>
    %c80 = arith.constant 80 : index
    %c0_33 = arith.constant 0 : index
    %32 = vector.load %arg5[%c80, %c0_33] : memref<216x800xf32, #tpu.memory_space<vmem>>, vector<8x800xf32>
    tpu.vector_store %arg5[%c80, %c0_33], %31 {strides = array<i32>} : memref<216x800xf32, #tpu.memory_space<vmem>>, vector<8x800xf32>,
    %c0_34 = arith.constant 0 : index
    %c0_35 = arith.constant 0 : index
    %c102 = arith.constant 102 : index
    %33 = vector.load %arg1[%c0_34, %c0_35, %c102] : memref<1x8x1100xf32, #tpu.memory_space<vmem>>, vector<1x8x800xf32>
    %34 = vector.shape_cast %33 : vector<1x8x800xf32> to vector<8x800xf32>
    %c88 = arith.constant 88 : index
    %c0_36 = arith.constant 0 : index
    %35 = vector.load %arg5[%c88, %c0_36] : memref<216x800xf32, #tpu.memory_space<vmem>>, vector<8x800xf32>
    tpu.vector_store %arg5[%c88, %c0_36], %34 {strides = array<i32>} : memref<216x800xf32, #tpu.memory_space<vmem>>, vector<8x800xf32>,
    %c0_37 = arith.constant 0 : index
    %c0_38 = arith.constant 0 : index
    %c110 = arith.constant 110 : index
    %36 = vector.load %arg1[%c0_37, %c0_38, %c110] : memref<1x8x1100xf32, #tpu.memory_space<vmem>>, vector<1x8x800xf32>
    %37 = vector.shape_cast %36 : vector<1x8x800xf32> to vector<8x800xf32>
    %c96 = arith.constant 96 : index
    %c0_39 = arith.constant 0 : index
    %38 = vector.load %arg5[%c96, %c0_39] : memref<216x800xf32, #tpu.memory_space<vmem>>, vector<8x800xf32>
    tpu.vector_store %arg5[%c96, %c0_39], %37 {strides = array<i32>} : memref<216x800xf32, #tpu.memory_space<vmem>>, vector<8x800xf32>,
    %c0_40 = arith.constant 0 : index
    %c0_41 = arith.constant 0 : index
    %c111 = arith.constant 111 : index
    %39 = vector.load %arg1[%c0_40, %c0_41, %c111] : memref<1x8x1100xf32, #tpu.memory_space<vmem>>, vector<1x8x800xf32>
    %40 = vector.shape_cast %39 : vector<1x8x800xf32> to vector<8x800xf32>
    %c104 = arith.constant 104 : index
    %c0_42 = arith.constant 0 : index
    %41 = vector.load %arg5[%c104, %c0_42] : memref<216x800xf32, #tpu.memory_space<vmem>>, vector<8x800xf32>
    tpu.vector_store %arg5[%c104, %c0_42], %40 {strides = array<i32>} : memref<216x800xf32, #tpu.memory_space<vmem>>, vector<8x800xf32>,
    %c0_43 = arith.constant 0 : index
    %c0_44 = arith.constant 0 : index
    %c112 = arith.constant 112 : index
    %42 = vector.load %arg1[%c0_43, %c0_44, %c112] : memref<1x8x1100xf32, #tpu.memory_space<vmem>>, vector<1x8x800xf32>
    %43 = vector.shape_cast %42 : vector<1x8x800xf32> to vector<8x800xf32>
    %c112_45 = arith.constant 112 : index
    %c0_46 = arith.constant 0 : index
    %44 = vector.load %arg5[%c112_45, %c0_46] : memref<216x800xf32, #tpu.memory_space<vmem>>, vector<8x800xf32>
    tpu.vector_store %arg5[%c112_45, %c0_46], %43 {strides = array<i32>} : memref<216x800xf32, #tpu.memory_space<vmem>>, vector<8x800xf32>,
    %c0_47 = arith.constant 0 : index
    %c0_48 = arith.constant 0 : index
    %c120 = arith.constant 120 : index
    %45 = vector.load %arg1[%c0_47, %c0_48, %c120] : memref<1x8x1100xf32, #tpu.memory_space<vmem>>, vector<1x8x800xf32>
    %46 = vector.shape_cast %45 : vector<1x8x800xf32> to vector<8x800xf32>
    %c120_49 = arith.constant 120 : index
    %c0_50 = arith.constant 0 : index
    %47 = vector.load %arg5[%c120_49, %c0_50] : memref<216x800xf32, #tpu.memory_space<vmem>>, vector<8x800xf32>
    tpu.vector_store %arg5[%c120_49, %c0_50], %46 {strides = array<i32>} : memref<216x800xf32, #tpu.memory_space<vmem>>, vector<8x800xf32>,
    %c0_51 = arith.constant 0 : index
    %c0_52 = arith.constant 0 : index
    %c121 = arith.constant 121 : index
    %48 = vector.load %arg1[%c0_51, %c0_52, %c121] : memref<1x8x1100xf32, #tpu.memory_space<vmem>>, vector<1x8x800xf32>
    %49 = vector.shape_cast %48 : vector<1x8x800xf32> to vector<8x800xf32>
    %c128 = arith.constant 128 : index
    %c0_53 = arith.constant 0 : index
    %50 = vector.load %arg5[%c128, %c0_53] : memref<216x800xf32, #tpu.memory_space<vmem>>, vector<8x800xf32>
    tpu.vector_store %arg5[%c128, %c0_53], %49 {strides = array<i32>} : memref<216x800xf32, #tpu.memory_space<vmem>>, vector<8x800xf32>,
    %c0_54 = arith.constant 0 : index
    %c0_55 = arith.constant 0 : index
    %c122 = arith.constant 122 : index
    %51 = vector.load %arg1[%c0_54, %c0_55, %c122] : memref<1x8x1100xf32, #tpu.memory_space<vmem>>, vector<1x8x800xf32>
    %52 = vector.shape_cast %51 : vector<1x8x800xf32> to vector<8x800xf32>
    %c136 = arith.constant 136 : index
    %c0_56 = arith.constant 0 : index
    %53 = vector.load %arg5[%c136, %c0_56] : memref<216x800xf32, #tpu.memory_space<vmem>>, vector<8x800xf32>
    tpu.vector_store %arg5[%c136, %c0_56], %52 {strides = array<i32>} : memref<216x800xf32, #tpu.memory_space<vmem>>, vector<8x800xf32>,
    %c0_57 = arith.constant 0 : index
    %c0_58 = arith.constant 0 : index
    %c200 = arith.constant 200 : index
    %54 = vector.load %arg1[%c0_57, %c0_58, %c200] : memref<1x8x1100xf32, #tpu.memory_space<vmem>>, vector<1x8x800xf32>
    %55 = vector.shape_cast %54 : vector<1x8x800xf32> to vector<8x800xf32>
    %c144 = arith.constant 144 : index
    %c0_59 = arith.constant 0 : index
    %56 = vector.load %arg5[%c144, %c0_59] : memref<216x800xf32, #tpu.memory_space<vmem>>, vector<8x800xf32>
    tpu.vector_store %arg5[%c144, %c0_59], %55 {strides = array<i32>} : memref<216x800xf32, #tpu.memory_space<vmem>>, vector<8x800xf32>,
    %c0_60 = arith.constant 0 : index
    %c0_61 = arith.constant 0 : index
    %c201 = arith.constant 201 : index
    %57 = vector.load %arg1[%c0_60, %c0_61, %c201] : memref<1x8x1100xf32, #tpu.memory_space<vmem>>, vector<1x8x800xf32>
    %58 = vector.shape_cast %57 : vector<1x8x800xf32> to vector<8x800xf32>
    %c152 = arith.constant 152 : index
    %c0_62 = arith.constant 0 : index
    %59 = vector.load %arg5[%c152, %c0_62] : memref<216x800xf32, #tpu.memory_space<vmem>>, vector<8x800xf32>
    tpu.vector_store %arg5[%c152, %c0_62], %58 {strides = array<i32>} : memref<216x800xf32, #tpu.memory_space<vmem>>, vector<8x800xf32>,
    %c0_63 = arith.constant 0 : index
    %c0_64 = arith.constant 0 : index
    %c202 = arith.constant 202 : index
    %60 = vector.load %arg1[%c0_63, %c0_64, %c202] : memref<1x8x1100xf32, #tpu.memory_space<vmem>>, vector<1x8x800xf32>
    %61 = vector.shape_cast %60 : vector<1x8x800xf32> to vector<8x800xf32>
    %c160 = arith.constant 160 : index
    %c0_65 = arith.constant 0 : index
    %62 = vector.load %arg5[%c160, %c0_65] : memref<216x800xf32, #tpu.memory_space<vmem>>, vector<8x800xf32>
    tpu.vector_store %arg5[%c160, %c0_65], %61 {strides = array<i32>} : memref<216x800xf32, #tpu.memory_space<vmem>>, vector<8x800xf32>,
    %c0_66 = arith.constant 0 : index
    %c0_67 = arith.constant 0 : index
    %c210 = arith.constant 210 : index
    %63 = vector.load %arg1[%c0_66, %c0_67, %c210] : memref<1x8x1100xf32, #tpu.memory_space<vmem>>, vector<1x8x800xf32>
    %64 = vector.shape_cast %63 : vector<1x8x800xf32> to vector<8x800xf32>
    %c168 = arith.constant 168 : index
    %c0_68 = arith.constant 0 : index
    %65 = vector.load %arg5[%c168, %c0_68] : memref<216x800xf32, #tpu.memory_space<vmem>>, vector<8x800xf32>
    tpu.vector_store %arg5[%c168, %c0_68], %64 {strides = array<i32>} : memref<216x800xf32, #tpu.memory_space<vmem>>, vector<8x800xf32>,
    %c0_69 = arith.constant 0 : index
    %c0_70 = arith.constant 0 : index
    %c211 = arith.constant 211 : index
    %66 = vector.load %arg1[%c0_69, %c0_70, %c211] : memref<1x8x1100xf32, #tpu.memory_space<vmem>>, vector<1x8x800xf32>
    %67 = vector.shape_cast %66 : vector<1x8x800xf32> to vector<8x800xf32>
    %c176 = arith.constant 176 : index
    %c0_71 = arith.constant 0 : index
    %68 = vector.load %arg5[%c176, %c0_71] : memref<216x800xf32, #tpu.memory_space<vmem>>, vector<8x800xf32>
    tpu.vector_store %arg5[%c176, %c0_71], %67 {strides = array<i32>} : memref<216x800xf32, #tpu.memory_space<vmem>>, vector<8x800xf32>,
    %c0_72 = arith.constant 0 : index
    %c0_73 = arith.constant 0 : index
    %c212 = arith.constant 212 : index
    %69 = vector.load %arg1[%c0_72, %c0_73, %c212] : memref<1x8x1100xf32, #tpu.memory_space<vmem>>, vector<1x8x800xf32>
    %70 = vector.shape_cast %69 : vector<1x8x800xf32> to vector<8x800xf32>
    %c184 = arith.constant 184 : index
    %c0_74 = arith.constant 0 : index
    %71 = vector.load %arg5[%c184, %c0_74] : memref<216x800xf32, #tpu.memory_space<vmem>>, vector<8x800xf32>
    tpu.vector_store %arg5[%c184, %c0_74], %70 {strides = array<i32>} : memref<216x800xf32, #tpu.memory_space<vmem>>, vector<8x800xf32>,
    %c0_75 = arith.constant 0 : index
    %c0_76 = arith.constant 0 : index
    %c220 = arith.constant 220 : index
    %72 = vector.load %arg1[%c0_75, %c0_76, %c220] : memref<1x8x1100xf32, #tpu.memory_space<vmem>>, vector<1x8x800xf32>
    %73 = vector.shape_cast %72 : vector<1x8x800xf32> to vector<8x800xf32>
    %c192 = arith.constant 192 : index
    %c0_77 = arith.constant 0 : index
    %74 = vector.load %arg5[%c192, %c0_77] : memref<216x800xf32, #tpu.memory_space<vmem>>, vector<8x800xf32>
    tpu.vector_store %arg5[%c192, %c0_77], %73 {strides = array<i32>} : memref<216x800xf32, #tpu.memory_space<vmem>>, vector<8x800xf32>,
    %c0_78 = arith.constant 0 : index
    %c0_79 = arith.constant 0 : index
    %c221 = arith.constant 221 : index
    %75 = vector.load %arg1[%c0_78, %c0_79, %c221] : memref<1x8x1100xf32, #tpu.memory_space<vmem>>, vector<1x8x800xf32>
    %76 = vector.shape_cast %75 : vector<1x8x800xf32> to vector<8x800xf32>
    %c200_80 = arith.constant 200 : index
    %c0_81 = arith.constant 0 : index
    %77 = vector.load %arg5[%c200_80, %c0_81] : memref<216x800xf32, #tpu.memory_space<vmem>>, vector<8x800xf32>
    tpu.vector_store %arg5[%c200_80, %c0_81], %76 {strides = array<i32>} : memref<216x800xf32, #tpu.memory_space<vmem>>, vector<8x800xf32>,
    %c0_82 = arith.constant 0 : index
    %c0_83 = arith.constant 0 : index
    %c222 = arith.constant 222 : index
    %78 = vector.load %arg1[%c0_82, %c0_83, %c222] : memref<1x8x1100xf32, #tpu.memory_space<vmem>>, vector<1x8x800xf32>
    %79 = vector.shape_cast %78 : vector<1x8x800xf32> to vector<8x800xf32>
    %c208 = arith.constant 208 : index
    %c0_84 = arith.constant 0 : index
    %80 = vector.load %arg5[%c208, %c0_84] : memref<216x800xf32, #tpu.memory_space<vmem>>, vector<8x800xf32>
    tpu.vector_store %arg5[%c208, %c0_84], %79 {strides = array<i32>} : memref<216x800xf32, #tpu.memory_space<vmem>>, vector<8x800xf32>,
    %c0_85 = arith.constant 0 : index
    %c0_86 = arith.constant 0 : index
    %81 = vector.load %arg2[%c0_85, %c0_86] : memref<4x216xf32, #tpu.memory_space<vmem>>, vector<4x216xf32>
    %c0_87 = arith.constant 0 : index
    %c0_88 = arith.constant 0 : index
    %82 = vector.load %arg5[%c0_87, %c0_88] : memref<216x800xf32, #tpu.memory_space<vmem>>, vector<216x800xf32>
    %cst = arith.constant dense<0.000000e+00> : vector<4x800xf32>
    %83 = tpu.matmul %81, %82, %cst {dimension_numbers = #tpu.dot_dimension_numbers<[1], [0], [0], [1], [0, 0, 1, 1], [], []>} : vector<4x216xf32>, vector<216x800xf32>, vector<4x800xf32> -> vector<4x800xf32>
    %c0_89 = arith.constant 0 : index
    %c0_90 = arith.constant 0 : index
    %84 = vector.load %arg3[%c0_89, %c0_90] : memref<4x1xf32, #tpu.memory_space<vmem>>, vector<4x1xf32>
    %85 = vector.broadcast %84 : vector<4x1xf32> to vector<4x800xf32>
    %86 = arith.addf %83, %85 : vector<4x800xf32>
    %c0_91 = arith.constant 0 : index
    %c0_92 = arith.constant 0 : index
    %c0_93 = arith.constant 0 : index
    %87 = vector.load %arg4[%c0_91, %c0_92, %c0_93] : memref<1x4x800xf32, #tpu.memory_space<vmem>>, vector<1x4x800xf32>
    %88 = vector.shape_cast %87 : vector<1x4x800xf32> to vector<4x800xf32>
    %89 = vector.shape_cast %86 : vector<4x800xf32> to vector<1x4x800xf32>
    tpu.vector_store %arg4[%c0_91, %c0_92, %c0_93], %89 {strides = array<i32>} : memref<1x4x800xf32, #tpu.memory_space<vmem>>, vector<1x4x800xf32>,
    return
  }
  func.func @transform_0(%arg0: i32) -> (i32, i32, i32) {
    %c0_i32 = arith.constant 0 : i32
    %c0_i32_0 = arith.constant 0 : i32
    %c0_i32_1 = arith.constant 0 : i32
    return %arg0, %c0_i32, %c0_i32_0 : i32, i32, i32
  }
  func.func @transform_1(%arg0: i32) -> (i32, i32) {
    %c0_i32 = arith.constant 0 : i32
    %c0_i32_0 = arith.constant 0 : i32
    %c0_i32_1 = arith.constant 0 : i32
    return %c0_i32, %c0_i32_0 : i32, i32
  }
  func.func @transform_2(%arg0: i32) -> (i32, i32) {
    %c0_i32 = arith.constant 0 : i32
    %c0_i32_0 = arith.constant 0 : i32
    %c0_i32_1 = arith.constant 0 : i32
    return %c0_i32, %c0_i32_0 : i32, i32
  }
  func.func @transform_3(%arg0: i32) -> (i32, i32, i32) {
    %c0_i32 = arith.constant 0 : i32
    %c0_i32_0 = arith.constant 0 : i32
    %c0_i32_1 = arith.constant 0 : i32
    return %arg0, %c0_i32, %c0_i32_0 : i32, i32, i32
  }
}

</mosaic_0001>

<bundles_post_ra>
// kernel: tpu_custom_call.1
= control target key start
LH: loop header
LB: loop body
LE: loop exit
PB: predicated region body
PF: predicated region fallthrough
CT: control target
= control target key end

     0   :  { %8 = vsyncpa [#allocation4], 0  ;;  %s3380_s0 = inlined_call_operand.hbm [shape: f32[2,8,1100], index: 0, kind: input, shape index: {}]   ;;  %s3381_s1 = inlined_call_operand.hbm [shape: f32[4,216], index: 1, kind: input, shape index: {}]   ;;  %s3382_s2 = inlined_call_operand.vmem [shape: f32[4,1], index: 2, kind: input, shape index: {}]   ;;  %s3383_s3 = inlined_call_operand.hbm [shape: f32[2,4,800], index: 3, kind: output, shape index: {}]  }
   0x1   :  { %10 = vsyncpa [#allocation4 + $0x1], 0 }
   0x2   :  { %11 = vsyncpa [#allocation7], 0 }
   0x3   :  { %12 = vsyncpa [#allocation5], 0 }
   0x4   :  { %14 = vsyncpa [#allocation5 + $0x1], 0  ;;  %s2428_s12 = smov 0   ;;  %s2430_s13 = smov 0  }
   0x5   :  { %s2432_s14 = smov 0   ;;  %s2434_s15 = smov 0  }
   0x6 LB: > { %s2449_s16 = sadd.s32 4294967295, %s2378_s15   ;;  %s2140_s17 = sadd.s32 4294967294, %s2378_s15   ;;  %s2378_s15 = sphi %s2434_s15, %s3393_s15   ;;  %s2374_s14 = sphi %s2432_s14, %s3392_s14   ;;  %s2370_s13 = sphi %s2430_s13, %s3391_s13   ;;  %s2366_s12 = sphi %s2428_s12, %s3390_s12  }
   0x7   : > { %p40_p0 = scmp.ne.s32.totalorder %s2370_s13, %s2366_s12  ;;  %p41_p1 = scmp.eq.s32.totalorder %s2449_s16, 0 }
   0x8   : > { %p106_p2 = scmp.eq.s32.totalorder %s2449_s16, 1  ;;  %p112_p3 = scmp.eq.s32.totalorder %s2140_s17, 1 }
   0x9   : > { %p2458_p4 = por %p41_p1, %p40_p0  ;;  %p2141_p5 = scmp.ge.s32.totalorder %s2378_s15, 1 }
   0xa   : > { %p2463_p6 = por %p112_p3, %p40_p0  ;;  %p119_p7 = scmp.lt.s32.totalorder %s2378_s15, 3 }
   0xb   : > { %s131_s22 = sshll.u32 %s3381_s1, 4  ;;  %s2380_s24 = smov [#allocation6]   ;;  %s132_s22 = int_to_ptr.hbm [resolvable:$true] %s131_s22 }
   0xc   : > { %p2471_p8 = pnand %p2141_p5, %p119_p7  ;;  %s133_s25 = sshll.u32 %s2380_s24, 4  ;;  %s134_s25 = int_to_ptr.vmem [resolvable:$true] %s133_s25 }
   0xd   : > { %s2481_s26 = sadd.s32 1, %s2378_s15   ;;  %s27_s27 = sadd.s32 1, %s2374_s14 }
   0xe   : > { %p2170_p10 = pneg %p2471_p8  ;;  %s24_s28 = ssub.s32 %s2378_s15, %s2481_s26 }
   0xf   : > { %p25_p12 = scmp.eq.s32.totalorder %s24_s28, 0  ;;  %p34_p13 = scmp.ne.s32.totalorder %s2374_s14, %s2370_s13 }
  0x10   : > { %p2171_p11 = pnand %p2170_p10, %p41_p1  ;;  %p35_p0 = scmp.eq.s32.totalorder %s2378_s15, 0 }
  0x11   : > { %p2183_p3 = scmp.lt.s32.totalorder %s2378_s15, 2  ;;  %p2495_p7 = por %p106_p2, %p34_p13 }
  0x12   : > { %2173 = dma.hbm_to_vmem [thread:$0]  (!%p2171_p11), %s132_s22, 128, %s134_s25, [#allocation7]  }
  0x13   : > { %s2491_s29 = scalar_select %p25_p12, %s2374_s14, %s27_s27  }
  0x14   : > { %p36_p5 = por %p35_p0, %p34_p13  ;;  %s147_s4 = sand.u32 1, %s2374_s14  }
  0x15   : > { %s2158_s5 = smul.u32 72, %s2378_s15  ;;  %s148_s21 = scalar_lea.sflag [#allocation4], %s147_s4 }
  0x16   : > { %s2157_s6 = smul.u32 72, %s147_s4  ;;  %p2504_p10 = pnand %p2183_p3, %p36_p5 }
  0x17   : > { %s156_s9 = scalar_lea.hbm %s3380_s0, %s2158_s5  ;;  %s2285_s28 = scalar_lea.hbm %s3380_s0, 144 }
  0x18   : > { %s158_s11 = sshll.u32 %s156_s9, 4  ;;  %s151_s17 = scalar_lea.vmem [#allocation3], %s2157_s6  ;;  %s159_s11 = int_to_ptr.hbm [resolvable:$true] %s158_s11 }
  0x19   : > { %s160_s20 = sshll.u32 %s151_s17, 4  ;;  %s2278_s22 = sshra.s32 %s159_s11, 4  ;;  %s161_s20 = int_to_ptr.vmem [resolvable:$true] %s160_s20  ;;  %s2279_s22 = int_to_ptr.hbm [resolvable:$true] %s2278_s22 }
  0x1a   : > { %s2280_s24 = scalar_lea.hbm %s2279_s22, 72  ;;  %p2282_p11 = pneg %p2504_p10 }
  0x1b   : > { %p2281_p2 = scmp.ne.s32.totalorder %s2279_s22, %s2280_s24  ;;  %p2286_p0 = scmp.lt.s32.totalorder %s2279_s22, %s3380_s0 }
  0x1c   : > { %p2287_p3 = scmp.lt.s32.totalorder %s2285_s28, %s2280_s24 }
  0x1d   : > { %p2283_p12 = pnand %p2282_p11, %p2281_p2 }
  0x1e   : > { %p2288_p5 = por %p2287_p3, %p2286_p0 }
  0x1f   : > { %p2284_p13 = pneg %p2283_p12 }
  0x21   : > { %p2289_p9 = pnand %p2288_p5, %p2284_p13 }
  0x23   : > { %2292 = shalt.err (!%p2289_p9)
}
  0x24   : > { %2177 = dma.hbm_to_vmem [thread:$0]  (!%p2504_p10), %s159_s11, 1152, %s161_s20, %s148_s21  }
  0x25   : > { %169 = sbr.rel (%p2471_p8) target bundleno = 820 (0x334), region = 32  ;;  %s2521_s4 = sand.u32 (!%p2471_p8), 1, %s2370_s13  }
  0x26   : > { %s2159_s6 = smul.u32 (!%p2471_p8), 72, %s2521_s4  ;;  %s172_s8 = scalar_lea.sflag (!%p2471_p8), [#allocation4], %s2521_s4 }
  0x28   : > { %s2525_s9 = scalar_lea.vmem (!%p2471_p8), [#allocation3], %s2159_s6 }
  0x2a   : > { %2353 = dma.done.wait (%p2458_p4), %s172_s8, 1152  }
  0x2b   : > { %2355 = vsyncadd (%p2458_p4), %s172_s8, 4294966144 }
  0x2c   : > { %2357 = dma.done.wait (%p41_p1), [#allocation7], 128  }
  0x2d   : > { %2359 = vsyncadd (%p41_p1), [#allocation7], 4294967168  ;;  %v2536_v0 = vld [vmem:[%s2525_s9 + $0x20] sm:$0xff]  ;;  %v2539_v1 = vld [vmem:[%s2525_s9 + $0x10] sm:$0xff]  ;;  %s2381_s18 = smov 127   ;;  %s2382_s23 = smov 126  }
  0x2e   : > { %v2542_v2 = vld [vmem:[%s2525_s9] sm:$0xff]  ;;  %241 = vrot.lane.b32.xlu2 %v2536_v0, %s2381_s18  ;;  %237 = vrot.lane.b32.xlu1 %v2539_v1, %s2381_s18  ;;  %v2548_v3 = vld [vmem:[%s2525_s9 + $0x28] sm:$0xff]  ;;  %s2383_s10 = smov 118   ;;  %s2384_s11 = smov 117   ;;  %vm247_vm0 = vcmask 1039360   ;;  %vm296_vm1 = vcmask 1031168  }
  0x2f   : > { %233 = vrot.lane.b32.xlu0 %v2542_v2, %s2381_s18  ;;  %v2551_v4 = vld [vmem:[%s2525_s9 + $0x18] sm:$0xff]  ;;  %v2554_v5 = vld [vmem:[%s2525_s9 + $0x8] sm:$0xff]  ;;  %v2560_v6 = vld [vmem:[%s2525_s9 + $0x30] sm:$0xff]  ;;  %s2385_s17 = smov 116   ;;  %s2386_s20 = smov 108   ;;  %vm217_vm2 = vcmask 261120  }
  0x30   : > { %s2387_s21 = smov 107   ;;  %s2388_s22 = smov 106   ;;  %vm345_vm3 = vcmask 965632   ;;  %v2648_v49 = vld [vmem:[%s2525_s9 + $0x38] sm:$0xff]  ;;  %vm394_vm4 = vcmask 957440   ;;  %vm443_vm5 = vcmask 949248  }
  0x31   : > { %s2389_s24 = smov 28   ;;  %s2390_s25 = smov 27   ;;  %vm492_vm6 = vcmask 883712   ;;  %vm541_vm7 = vcmask 875520   ;;  %vm590_vm8 = vcmask 867328   ;;  %vm643_vm9 = vcmask 228352  }
  0x32   : > { %s2391_s27 = smov 26   ;;  %s2392_s28 = smov 18   ;;  %vm697_vm10 = vcmask 220160   ;;  %vm751_vm11 = vcmask 211968   ;;  %vm805_vm12 = vcmask 146432   ;;  %vm859_vm13 = vcmask 138240  }
  0x33   : > { %s2393_s5 = smov 17   ;;  %s2394_s7 = smov 16   ;;  %vm913_vm14 = vcmask 130048   ;;  %vm967_vm15 = vcmask 64512  }
  0x34   : > { %s2395_s6 = smov 8   ;;  %s2396_s8 = smov 34  }
  0x36   : > { %243 = vrot.lane.b32.xlu2 %v2548_v3, %s2381_s18  ;;  %239 = vrot.lane.b32.xlu1 %v2551_v4, %s2381_s18 }
  0x37   : > { %235 = vrot.lane.b32.xlu0 %v2554_v5, %s2381_s18 }
  0x3e   : > { %284 = vrot.lane.b32.xlu2 %v2554_v5, %s2382_s23  ;;  %282 = vrot.lane.b32.xlu1 %v2542_v2, %s2382_s23 }
  0x3f   : > { %245 = vrot.lane.b32.xlu0 %v2560_v6, %s2381_s18  ;;  %s2397_s18 = smov 36  }
  0x46   : > { %290 = vrot.lane.b32.xlu2 %v2536_v0, %s2382_s23  ;;  %288 = vrot.lane.b32.xlu1 %v2551_v4, %s2382_s23 }
  0x47   : > { %286 = vrot.lane.b32.xlu0 %v2539_v1, %s2382_s23 }
  0x4e   : > { %331 = vrot.lane.b32.xlu2 %v2542_v2, %s2383_s10  ;;  %294 = vrot.lane.b32.xlu1 %v2560_v6, %s2382_s23 }
  0x4f   : > { %292 = vrot.lane.b32.xlu0 %v2548_v3, %s2382_s23  ;;  %s2398_s23 = smov 35  }
  0x56   : > { %337 = vrot.lane.b32.xlu2 %v2551_v4, %s2383_s10  ;;  %335 = vrot.lane.b32.xlu1 %v2539_v1, %s2383_s10 }
  0x57   : > { %333 = vrot.lane.b32.xlu0 %v2554_v5, %s2383_s10 }
  0x5e   : > { %343 = vrot.lane.b32.xlu2 %v2560_v6, %s2383_s10  ;;  %341 = vrot.lane.b32.xlu1 %v2548_v3, %s2383_s10 }
  0x5f   : > { %339 = vrot.lane.b32.xlu0 %v2536_v0, %s2383_s10  ;;  %s2399_s10 = smov 44  }
  0x66   : > { %384 = vrot.lane.b32.xlu2 %v2539_v1, %s2384_s11  ;;  %382 = vrot.lane.b32.xlu1 %v2554_v5, %s2384_s11 }
  0x67   : > { %380 = vrot.lane.b32.xlu0 %v2542_v2, %s2384_s11 }
  0x6e   : > { %390 = vrot.lane.b32.xlu2 %v2548_v3, %s2384_s11  ;;  %388 = vrot.lane.b32.xlu1 %v2536_v0, %s2384_s11 }
  0x6f   : > { %386 = vrot.lane.b32.xlu0 %v2551_v4, %s2384_s11 }
  0x76   : > { %431 = vrot.lane.b32.xlu2 %v2554_v5, %s2385_s17  ;;  %429 = vrot.lane.b32.xlu1 %v2542_v2, %s2385_s17 }
  0x77   : > { %392 = vrot.lane.b32.xlu0 %v2560_v6, %s2384_s11  ;;  %s2400_s11 = smov 45  }
  0x7e   : > { %437 = vrot.lane.b32.xlu2 %v2536_v0, %s2385_s17  ;;  %435 = vrot.lane.b32.xlu1 %v2551_v4, %s2385_s17 }
  0x7f   : > { %433 = vrot.lane.b32.xlu0 %v2539_v1, %s2385_s17 }
  0x86   : > { %478 = vrot.lane.b32.xlu2 %v2542_v2, %s2386_s20  ;;  %441 = vrot.lane.b32.xlu1 %v2560_v6, %s2385_s17 }
  0x87   : > { %439 = vrot.lane.b32.xlu0 %v2548_v3, %s2385_s17  ;;  %s2401_s17 = smov 46  }
  0x88   : > { %v242_v7 = vpop.permute.xlu2 %241 }
  0x8e   : > { %484 = vrot.lane.b32.xlu2 %v2551_v4, %s2386_s20  ;;  %482 = vrot.lane.b32.xlu1 %v2539_v1, %s2386_s20 }
  0x8f   : > { %480 = vrot.lane.b32.xlu0 %v2554_v5, %s2386_s20 }
  0x90   : > { %v244_v8 = vpop.permute.xlu2 %243 }
  0x91   : > { %v252_v9 = vsel %vm247_vm0, %v242_v7, %v244_v8 }
  0x92   : > { %265 = vst [vmem:[#allocation2 + $0x58] sm:$0xff] %v252_v9 }
  0x96   : > { %490 = vrot.lane.b32.xlu2 %v2560_v6, %s2386_s20  ;;  %488 = vrot.lane.b32.xlu1 %v2548_v3, %s2386_s20 }
  0x97   : > { %486 = vrot.lane.b32.xlu0 %v2536_v0, %s2386_s20  ;;  %s2402_s20 = smov 54  }
  0x98   : > { %v285_v10 = vpop.permute.xlu2 %284 }
  0x9e   : > { %531 = vrot.lane.b32.xlu2 %v2539_v1, %s2387_s21  ;;  %529 = vrot.lane.b32.xlu1 %v2554_v5, %s2387_s21 }
  0x9f   : > { %527 = vrot.lane.b32.xlu0 %v2542_v2, %s2387_s21 }
  0xa0   : > { %v291_v11 = vpop.permute.xlu2 %290  ;;  %v238_v12 = vpop.permute.xlu1 %237 }
  0xa1   : > { %v234_v13 = vpop.permute.xlu0 %233 }
  0xa6   : > { %537 = vrot.lane.b32.xlu2 %v2548_v3, %s2387_s21  ;;  %535 = vrot.lane.b32.xlu1 %v2536_v0, %s2387_s21 }
  0xa7   : > { %533 = vrot.lane.b32.xlu0 %v2551_v4, %s2387_s21 }
  0xa8   : > { %v332_v14 = vpop.permute.xlu2 %331  ;;  %v240_v15 = vpop.permute.xlu1 %239 }
  0xa9   : > { %v250_v16 = vsel %vm247_vm0, %v238_v12, %v240_v15  ;;  %v251_v17 = vsel %vm247_vm0, %v240_v15, %v242_v7  ;;  %v236_v18 = vpop.permute.xlu0 %235 }
  0xaa   : > { %263 = vst [vmem:[#allocation2 + $0x48] sm:$0xff] %v250_v16  ;;  %v248_v19 = vsel %vm247_vm0, %v234_v13, %v236_v18  ;;  %v249_v20 = vsel %vm247_vm0, %v236_v18, %v238_v12 }
  0xab   : > { %264 = vst [vmem:[#allocation2 + $0x50] sm:$0xff] %v251_v17 }
  0xac   : > { %261 = vst [vmem:[#allocation2 + $0x38] sm:$0xff] %v248_v19 }
  0xad   : > { %262 = vst [vmem:[#allocation2 + $0x40] sm:$0xff] %v249_v20 }
  0xae   : > { %578 = vrot.lane.b32.xlu2 %v2554_v5, %s2388_s22  ;;  %576 = vrot.lane.b32.xlu1 %v2542_v2, %s2388_s22 }
  0xaf   : > { %539 = vrot.lane.b32.xlu0 %v2560_v6, %s2387_s21  ;;  %s2403_s21 = smov 55  }
  0xb0   : > { %v338_v21 = vpop.permute.xlu2 %337  ;;  %v283_v22 = vpop.permute.xlu1 %282 }
  0xb1   : > { %v297_v23 = vsel %vm296_vm1, %v283_v22, %v285_v10  ;;  %v246_v24 = vpop.permute.xlu0 %245 }
  0xb2   : > { %310 = vst [vmem:[#allocation2 + $0x70] sm:$0xff] %v297_v23  ;;  %v253_v25 = vsel %vm247_vm0, %v244_v8, %v246_v24  ;;  %vm1517_vm0 = vcmask 277504  }
  0xb3   : > { %266 = vst [vmem:[#allocation2 + $0x60] sm:$0xff] %v253_v25 }
  0xb4   : > { %267 = vst.msk [vmem:[#allocation2 + $0x68] sm:$0xff] %vm217_vm2, %v246_v24 }
  0xb6   : > { %584 = vrot.lane.b32.xlu2 %v2536_v0, %s2388_s22  ;;  %582 = vrot.lane.b32.xlu1 %v2551_v4, %s2388_s22 }
  0xb7   : > { %580 = vrot.lane.b32.xlu0 %v2539_v1, %s2388_s22 }
  0xb8   : > { %v344_v26 = vpop.permute.xlu2 %343  ;;  %v289_v27 = vpop.permute.xlu1 %288 }
  0xb9   : > { %365 = vst.msk [vmem:[#allocation2 + $0xd8] sm:$0xff] %vm217_vm2, %v344_v26  ;;  %v300_v28 = vsel %vm296_vm1, %v289_v27, %v291_v11  ;;  %v287_v29 = vpop.permute.xlu0 %286 }
  0xba   : > { %313 = vst [vmem:[#allocation2 + $0x88] sm:$0xff] %v300_v28  ;;  %v298_v30 = vsel %vm296_vm1, %v285_v10, %v287_v29  ;;  %v299_v31 = vsel %vm296_vm1, %v287_v29, %v289_v27 }
  0xbb   : > { %311 = vst [vmem:[#allocation2 + $0x78] sm:$0xff] %v298_v30 }
  0xbc   : > { %312 = vst [vmem:[#allocation2 + $0x80] sm:$0xff] %v299_v31 }
  0xbe   : > { %627 = vrot.lane.b32.xlu2 %v2542_v2, %s2389_s24  ;;  %588 = vrot.lane.b32.xlu1 %v2560_v6, %s2388_s22 }
  0xbf   : > { %586 = vrot.lane.b32.xlu0 %v2548_v3, %s2388_s22  ;;  %s2404_s22 = smov 56  }
  0xc0   : > { %v385_v32 = vpop.permute.xlu2 %384  ;;  %v295_v33 = vpop.permute.xlu1 %294 }
  0xc1   : > { %316 = vst.msk [vmem:[#allocation2 + $0xa0] sm:$0xff] %vm217_vm2, %v295_v33  ;;  %v293_v34 = vpop.permute.xlu0 %292 }
  0xc2   : > { %v301_v35 = vsel %vm296_vm1, %v291_v11, %v293_v34  ;;  %v302_v36 = vsel %vm296_vm1, %v293_v34, %v295_v33  ;;  %vm1468_vm1 = vcmask 285696  }
  0xc3   : > { %314 = vst [vmem:[#allocation2 + $0x90] sm:$0xff] %v301_v35 }
  0xc4   : > { %315 = vst [vmem:[#allocation2 + $0x98] sm:$0xff] %v302_v36 }
  0xc6   : > { %633 = vrot.lane.b32.xlu2 %v2551_v4, %s2389_s24  ;;  %631 = vrot.lane.b32.xlu1 %v2539_v1, %s2389_s24 }
  0xc7   : > { %629 = vrot.lane.b32.xlu0 %v2554_v5, %s2389_s24 }
  0xc8   : > { %v391_v37 = vpop.permute.xlu2 %390  ;;  %v336_v38 = vpop.permute.xlu1 %335 }
  0xc9   : > { %v348_v39 = vsel %vm345_vm3, %v336_v38, %v338_v21  ;;  %v334_v40 = vpop.permute.xlu0 %333 }
  0xca   : > { %361 = vst [vmem:[#allocation2 + $0xb8] sm:$0xff] %v348_v39  ;;  %v346_v41 = vsel %vm345_vm3, %v332_v14, %v334_v40  ;;  %v347_v42 = vsel %vm345_vm3, %v334_v40, %v336_v38 }
  0xcb   : > { %359 = vst [vmem:[#allocation2 + $0xa8] sm:$0xff] %v346_v41 }
  0xcc   : > { %360 = vst [vmem:[#allocation2 + $0xb0] sm:$0xff] %v347_v42 }
  0xce   : > { %639 = vrot.lane.b32.xlu2 %v2560_v6, %s2389_s24  ;;  %637 = vrot.lane.b32.xlu1 %v2548_v3, %s2389_s24 }
  0xcf   : > { %635 = vrot.lane.b32.xlu0 %v2536_v0, %s2389_s24 }
  0xd0   : > { %v432_v43 = vpop.permute.xlu2 %431  ;;  %v342_v44 = vpop.permute.xlu1 %341 }
  0xd1   : > { %v351_v45 = vsel %vm345_vm3, %v342_v44, %v344_v26  ;;  %v340_v46 = vpop.permute.xlu0 %339 }
  0xd2   : > { %364 = vst [vmem:[#allocation2 + $0xd0] sm:$0xff] %v351_v45  ;;  %v349_v47 = vsel %vm345_vm3, %v338_v21, %v340_v46  ;;  %v350_v48 = vsel %vm345_vm3, %v340_v46, %v342_v44  ;;  %vm1419_vm3 = vcmask 293888  }
  0xd3   : > { %362 = vst [vmem:[#allocation2 + $0xc0] sm:$0xff] %v349_v47 }
  0xd4   : > { %363 = vst [vmem:[#allocation2 + $0xc8] sm:$0xff] %v350_v48 }
  0xd6   : > { %683 = vrot.lane.b32.xlu2 %v2554_v5, %s2390_s25  ;;  %681 = vrot.lane.b32.xlu1 %v2542_v2, %s2390_s25 }
  0xd7   : > { %641 = vrot.lane.b32.xlu0 %v2648_v49, %s2389_s24  ;;  %s2405_s24 = smov 6  }
  0xd8   : > { %v438_v50 = vpop.permute.xlu2 %437  ;;  %v383_v51 = vpop.permute.xlu1 %382 }
  0xd9   : > { %v396_v52 = vsel %vm394_vm4, %v383_v51, %v385_v32  ;;  %v381_v53 = vpop.permute.xlu0 %380 }
  0xda   : > { %409 = vst [vmem:[#allocation2 + $0xe8] sm:$0xff] %v396_v52  ;;  %v395_v54 = vsel %vm394_vm4, %v381_v53, %v383_v51 }
  0xdb   : > { %408 = vst [vmem:[#allocation2 + $0xe0] sm:$0xff] %v395_v54 }
  0xde   : > { %689 = vrot.lane.b32.xlu2 %v2536_v0, %s2390_s25  ;;  %687 = vrot.lane.b32.xlu1 %v2551_v4, %s2390_s25 }
  0xdf   : > { %685 = vrot.lane.b32.xlu0 %v2539_v1, %s2390_s25 }
  0xe0   : > { %v479_v55 = vpop.permute.xlu2 %478  ;;  %v389_v56 = vpop.permute.xlu1 %388 }
  0xe1   : > { %v399_v57 = vsel %vm394_vm4, %v389_v56, %v391_v37  ;;  %v387_v58 = vpop.permute.xlu0 %386 }
  0xe2   : > { %412 = vst [vmem:[#allocation2 + $0x100] sm:$0xff] %v399_v57  ;;  %v397_v59 = vsel %vm394_vm4, %v385_v32, %v387_v58  ;;  %v398_v60 = vsel %vm394_vm4, %v387_v58, %v389_v56 }
  0xe3   : > { %410 = vst [vmem:[#allocation2 + $0xf0] sm:$0xff] %v397_v59 }
  0xe4   : > { %411 = vst [vmem:[#allocation2 + $0xf8] sm:$0xff] %v398_v60 }
  0xe6   : > { %695 = vrot.lane.b32.xlu2 %v2648_v49, %s2390_s25  ;;  %693 = vrot.lane.b32.xlu1 %v2560_v6, %s2390_s25 }
  0xe7   : > { %691 = vrot.lane.b32.xlu0 %v2548_v3, %s2390_s25  ;;  %s2406_s25 = smov 7  }
  0xe8   : > { %v485_v61 = vpop.permute.xlu2 %484  ;;  %v430_v62 = vpop.permute.xlu1 %429 }
  0xe9   : > { %v2666_v63 = vsel %vm443_vm5, %v430_v62, %v432_v43  ;;  %v393_v7 = vpop.permute.xlu0 %392 }
  0xea   : > { %v400_v8 = vsel %vm394_vm4, %v391_v37, %v393_v7  ;;  %414 = vst.msk [vmem:[#allocation2 + $0x110] sm:$0xff] %vm217_vm2, %v393_v7  ;;  %vm1370_vm4 = vcmask 359424  }
  0xeb   : > { %413 = vst [vmem:[#allocation2 + $0x108] sm:$0xff] %v400_v8 }
  0xee   : > { %739 = vrot.lane.b32.xlu2 %v2539_v1, %s2391_s27  ;;  %737 = vrot.lane.b32.xlu1 %v2554_v5, %s2391_s27 }
  0xef   : > { %735 = vrot.lane.b32.xlu0 %v2542_v2, %s2391_s27 }
  0xf0   : > { %v491_v9 = vpop.permute.xlu2 %490  ;;  %v436_v10 = vpop.permute.xlu1 %435 }
  0xf1   : > { %512 = vst.msk [vmem:[#allocation2 + $0x180] sm:$0xff] %vm217_vm2, %v491_v9  ;;  %v447_v11 = vsel %vm443_vm5, %v436_v10, %v438_v50  ;;  %v434_v12 = vpop.permute.xlu0 %433 }
  0xf2   : > { %460 = vst [vmem:[#allocation2 + $0x130] sm:$0xff] %v447_v11  ;;  %v2676_v13 = vsel %vm443_vm5, %v432_v43, %v434_v12  ;;  %v446_v14 = vsel %vm443_vm5, %v434_v12, %v436_v10 }
  0xf3   : > { %459 = vst [vmem:[#allocation2 + $0x128] sm:$0xff] %v446_v14 }
  0xf6   : > { %745 = vrot.lane.b32.xlu2 %v2548_v3, %s2391_s27  ;;  %743 = vrot.lane.b32.xlu1 %v2536_v0, %s2391_s27 }
  0xf7   : > { %741 = vrot.lane.b32.xlu0 %v2551_v4, %s2391_s27 }
  0xf8   : > { %v532_v15 = vpop.permute.xlu2 %531  ;;  %v442_v16 = vpop.permute.xlu1 %441 }
  0xf9   : > { %463 = vst.msk [vmem:[#allocation2 + $0x148] sm:$0xff] %vm217_vm2, %v442_v16  ;;  %v440_v17 = vpop.permute.xlu0 %439 }
  0xfa   : > { %v448_v18 = vsel %vm443_vm5, %v438_v50, %v440_v17  ;;  %v449_v19 = vsel %vm443_vm5, %v440_v17, %v442_v16  ;;  %vm1321_vm5 = vcmask 367616  }
  0xfb   : > { %461 = vst [vmem:[#allocation2 + $0x138] sm:$0xff] %v448_v18 }
  0xfc   : > { %462 = vst [vmem:[#allocation2 + $0x140] sm:$0xff] %v449_v19 }
  0xfe   : > { %789 = vrot.lane.b32.xlu2 %v2542_v2, %s2392_s28  ;;  %749 = vrot.lane.b32.xlu1 %v2648_v49, %s2391_s27 }
  0xff   : > { %747 = vrot.lane.b32.xlu0 %v2560_v6, %s2391_s27 }
 0x100   : > { %v538_v20 = vpop.permute.xlu2 %537  ;;  %v483_v21 = vpop.permute.xlu1 %482 }
 0x101   : > { %v495_v22 = vsel %vm492_vm6, %v483_v21, %v485_v61  ;;  %v481_v23 = vpop.permute.xlu0 %480 }
 0x102   : > { %508 = vst [vmem:[#allocation2 + $0x160] sm:$0xff] %v495_v22  ;;  %v2691_v24 = vsel %vm492_vm6, %v479_v55, %v481_v23  ;;  %v2694_v25 = vsel %vm492_vm6, %v481_v23, %v483_v21 }
 0x106   : > { %795 = vrot.lane.b32.xlu2 %v2551_v4, %s2392_s28  ;;  %793 = vrot.lane.b32.xlu1 %v2539_v1, %s2392_s28 }
 0x107   : > { %791 = vrot.lane.b32.xlu0 %v2554_v5, %s2392_s28 }
 0x108   : > { %v579_v26 = vpop.permute.xlu2 %578  ;;  %v489_v27 = vpop.permute.xlu1 %488 }
 0x109   : > { %v498_v28 = vsel %vm492_vm6, %v489_v27, %v491_v9  ;;  %v487_v29 = vpop.permute.xlu0 %486 }
 0x10a   : > { %511 = vst [vmem:[#allocation2 + $0x178] sm:$0xff] %v498_v28  ;;  %v496_v30 = vsel %vm492_vm6, %v485_v61, %v487_v29  ;;  %v497_v31 = vsel %vm492_vm6, %v487_v29, %v489_v27  ;;  %vm1272_vm6 = vcmask 375808  }
 0x10b   : > { %509 = vst [vmem:[#allocation2 + $0x168] sm:$0xff] %v496_v30 }
 0x10c   : > { %510 = vst [vmem:[#allocation2 + $0x170] sm:$0xff] %v497_v31 }
 0x10e   : > { %801 = vrot.lane.b32.xlu2 %v2560_v6, %s2392_s28  ;;  %799 = vrot.lane.b32.xlu1 %v2548_v3, %s2392_s28 }
 0x10f   : > { %797 = vrot.lane.b32.xlu0 %v2536_v0, %s2392_s28 }
 0x110   : > { %v585_v32 = vpop.permute.xlu2 %584  ;;  %v530_v33 = vpop.permute.xlu1 %529 }
 0x111   : > { %v2712_v34 = vsel %vm541_vm7, %v530_v33, %v532_v15  ;;  %v528_v35 = vpop.permute.xlu0 %527 }
 0x112   : > { %v2715_v36 = vsel %vm541_vm7, %v528_v35, %v530_v33 }
 0x116   : > { %845 = vrot.lane.b32.xlu2 %v2554_v5, %s2393_s5  ;;  %843 = vrot.lane.b32.xlu1 %v2542_v2, %s2393_s5 }
 0x117   : > { %803 = vrot.lane.b32.xlu0 %v2648_v49, %s2392_s28 }
 0x118   : > { %v628_v37 = vpop.permute.xlu2 %627  ;;  %v536_v38 = vpop.permute.xlu1 %535 }
 0x119   : > { %v546_v39 = vsel %vm541_vm7, %v536_v38, %v538_v20  ;;  %v534_v40 = vpop.permute.xlu0 %533 }
 0x11a   : > { %559 = vst [vmem:[#allocation2 + $0x1a8] sm:$0xff] %v546_v39  ;;  %v544_v41 = vsel %vm541_vm7, %v532_v15, %v534_v40  ;;  %v2724_v42 = vsel %vm541_vm7, %v534_v40, %v536_v38 }
 0x11b   : > { %557 = vst [vmem:[#allocation2 + $0x198] sm:$0xff] %v544_v41 }
 0x11e   : > { %851 = vrot.lane.b32.xlu2 %v2536_v0, %s2393_s5  ;;  %849 = vrot.lane.b32.xlu1 %v2551_v4, %s2393_s5 }
 0x11f   : > { %847 = vrot.lane.b32.xlu0 %v2539_v1, %s2393_s5 }
 0x120   : > { %v634_v43 = vpop.permute.xlu2 %633  ;;  %v577_v44 = vpop.permute.xlu1 %576 }
 0x121   : > { %v2730_v45 = vsel %vm590_vm8, %v577_v44, %v579_v26  ;;  %v540_v46 = vpop.permute.xlu0 %539 }
 0x122   : > { %v547_v47 = vsel %vm541_vm7, %v538_v20, %v540_v46  ;;  %561 = vst.msk [vmem:[#allocation2 + $0x1b8] sm:$0xff] %vm217_vm2, %v540_v46  ;;  %vm1174_vm7 = vcmask 449536  }
 0x123   : > { %560 = vst [vmem:[#allocation2 + $0x1b0] sm:$0xff] %v547_v47 }
 0x126   : > { %857 = vrot.lane.b32.xlu2 %v2648_v49, %s2393_s5  ;;  %855 = vrot.lane.b32.xlu1 %v2560_v6, %s2393_s5 }
 0x127   : > { %853 = vrot.lane.b32.xlu0 %v2548_v3, %s2393_s5 }
 0x128   : > { %v640_v48 = vpop.permute.xlu2 %639  ;;  %v583_v50 = vpop.permute.xlu1 %582 }
 0x129   : > { %v2738_v51 = vsel %vm590_vm8, %v583_v50, %v585_v32  ;;  %v581_v52 = vpop.permute.xlu0 %580 }
 0x12a   : > { %v2741_v53 = vsel %vm590_vm8, %v579_v26, %v581_v52  ;;  %v593_v54 = vsel %vm590_vm8, %v581_v52, %v583_v50 }
 0x12b   : > { %606 = vst [vmem:[#allocation2 + $0x1d0] sm:$0xff] %v593_v54 }
 0x12e   : > { %901 = vrot.lane.b32.xlu2 %v2539_v1, %s2394_s7  ;;  %899 = vrot.lane.b32.xlu1 %v2554_v5, %s2394_s7 }
 0x12f   : > { %897 = vrot.lane.b32.xlu0 %v2542_v2, %s2394_s7 }
 0x130   : > { %v684_v55 = vpop.permute.xlu2 %683  ;;  %v589_v56 = vpop.permute.xlu1 %588 }
 0x131   : > { %610 = vst.msk [vmem:[#allocation2 + $0x1f0] sm:$0xff] %vm217_vm2, %v589_v56  ;;  %v587_v57 = vpop.permute.xlu0 %586 }
 0x132   : > { %v595_v58 = vsel %vm590_vm8, %v585_v32, %v587_v57  ;;  %v596_v59 = vsel %vm590_vm8, %v587_v57, %v589_v56  ;;  %vm1223_vm8 = vcmask 441344  }
 0x133   : > { %608 = vst [vmem:[#allocation2 + $0x1e0] sm:$0xff] %v595_v58 }
 0x134   : > { %609 = vst [vmem:[#allocation2 + $0x1e8] sm:$0xff] %v596_v59 }
 0x136   : > { %907 = vrot.lane.b32.xlu2 %v2548_v3, %s2394_s7  ;;  %905 = vrot.lane.b32.xlu1 %v2536_v0, %s2394_s7 }
 0x137   : > { %903 = vrot.lane.b32.xlu0 %v2551_v4, %s2394_s7 }
 0x138   : > { %v690_v60 = vpop.permute.xlu2 %689  ;;  %v632_v61 = vpop.permute.xlu1 %631 }
 0x139   : > { %v646_v62 = vsel %vm643_vm9, %v632_v61, %v634_v43  ;;  %v630_v7 = vpop.permute.xlu0 %629 }
 0x13a   : > { %660 = vst [vmem:[#allocation2 + $0x208] sm:$0xff] %v646_v62  ;;  %v2755_v8 = vsel %vm643_vm9, %v628_v37, %v630_v7  ;;  %v2758_v9 = vsel %vm643_vm9, %v630_v7, %v632_v61  ;;  %v2855_v61 = vld [vmem:[%s2525_s9 + $0x18] sm:$0xff] }
 0x13e   : > { %951 = vrot.lane.b32.xlu2 %v2542_v2, %s2395_s6  ;;  %911 = vrot.lane.b32.xlu1 %v2648_v49, %s2394_s7 }
 0x13f   : > { %909 = vrot.lane.b32.xlu0 %v2560_v6, %s2394_s7  ;;  %s2161_s7 = smul.u32 28, %s2449_s16 }
 0x140   : > { %v696_v10 = vpop.permute.xlu2 %695  ;;  %v638_v11 = vpop.permute.xlu1 %637 }
 0x141   : > { %v649_v12 = vsel %vm643_vm9, %v638_v11, %v640_v48  ;;  %v636_v14 = vpop.permute.xlu0 %635 }
 0x142   : > { %663 = vst [vmem:[#allocation2 + $0x220] sm:$0xff] %v649_v12  ;;  %v2766_v15 = vsel %vm643_vm9, %v634_v43, %v636_v14  ;;  %v648_v16 = vsel %vm643_vm9, %v636_v14, %v638_v11 }
 0x143   : > { %662 = vst [vmem:[#allocation2 + $0x218] sm:$0xff] %v648_v16 }
 0x146   : > { %957 = vrot.lane.b32.xlu2 %v2551_v4, %s2395_s6  ;;  %955 = vrot.lane.b32.xlu1 %v2539_v1, %s2395_s6 }
 0x147   : > { %953 = vrot.lane.b32.xlu0 %v2554_v5, %s2395_s6 }
 0x148   : > { %v740_v2 = vpop.permute.xlu2 %739  ;;  %v682_v17 = vpop.permute.xlu1 %681 }
 0x149   : > { %v2776_v18 = vsel %vm697_vm10, %v682_v17, %v684_v55  ;;  %v642_v19 = vpop.permute.xlu0 %641 }
 0x14a   : > { %v650_v20 = vsel %vm643_vm9, %v640_v48, %v642_v19  ;;  %v2878_v19 = vld [vmem:[%s2525_s9] sm:$0xff]  ;;  %vm1075_vm9 = vcmask 48128  }
 0x14b   : > { %664 = vst.msk [vmem:[#allocation2 + $0x228] sm:$0xff] %vm217_vm2, %v650_v20 }
 0x14e   : > { %963 = vrot.lane.b32.xlu2 %v2560_v6, %s2395_s6  ;;  %961 = vrot.lane.b32.xlu1 %v2548_v3, %s2395_s6 }
 0x14f   : > { %959 = vrot.lane.b32.xlu0 %v2536_v0, %s2395_s6 }
 0x150   : > { %v746_v21 = vpop.permute.xlu2 %745  ;;  %v688_v22 = vpop.permute.xlu1 %687 }
 0x151   : > { %v2787_v23 = vsel %vm697_vm10, %v688_v22, %v690_v60  ;;  %v686_v26 = vpop.permute.xlu0 %685 }
 0x152   : > { %v2790_v27 = vsel %vm697_vm10, %v684_v55, %v686_v26  ;;  %v700_v28 = vsel %vm697_vm10, %v686_v26, %v688_v22 }
 0x153   : > { %714 = vst [vmem:[#allocation2 + $0x240] sm:$0xff] %v700_v28 }
 0x156   : > { %1507 = vrot.lane.b32.xlu2 %v2551_v4, %s2396_s8  ;;  %1505 = vrot.lane.b32.xlu1 %v2539_v1, %s2396_s8 }
 0x157   : > { %965 = vrot.lane.b32.xlu0 %v2648_v49, %s2395_s6  ;;  %v2808_v49 = vld [vmem:[%s2525_s9 + $0x8] sm:$0xff] }
 0x158   : > { %v790_v0 = vpop.permute.xlu2 %789  ;;  %v694_v3 = vpop.permute.xlu1 %693 }
 0x159   : > { %v704_v6 = vsel %vm697_vm10, %v694_v3, %v696_v10  ;;  %v692_v29 = vpop.permute.xlu0 %691 }
 0x15a   : > { %718 = vst.msk [vmem:[#allocation2 + $0x260] sm:$0xff] %vm217_vm2, %v704_v6  ;;  %v702_v30 = vsel %vm697_vm10, %v690_v60, %v692_v29  ;;  %v703_v31 = vsel %vm697_vm10, %v692_v29, %v694_v3  ;;  %vm1125_vm10 = vcmask 457728  }
 0x15b   : > { %716 = vst [vmem:[#allocation2 + $0x250] sm:$0xff] %v702_v30 }
 0x15c   : > { %717 = vst [vmem:[#allocation2 + $0x258] sm:$0xff] %v703_v31 }
 0x15e   : > { %1407 = vrot.lane.b32.xlu2 %v2539_v1, %s2397_s18  ;;  %1458 = vrot.lane.b32.xlu1 %v2551_v4, %s2398_s23 }
 0x15f   : > { %1456 = vrot.lane.b32.xlu0 %v2539_v1, %s2398_s23 }
 0x160   : > { %v796_v32 = vpop.permute.xlu2 %795  ;;  %v738_v33 = vpop.permute.xlu1 %737 }
 0x161   : > { %v2813_v35 = vsel %vm751_vm11, %v738_v33, %v740_v2  ;;  %v736_v37 = vpop.permute.xlu0 %735 }
 0x162   : > { %v2816_v38 = vsel %vm751_vm11, %v736_v37, %v738_v33  ;;  %v2905_v33 = vld [vmem:[%s2525_s9 + $0x20] sm:$0xff] }
 0x166   : > { %1358 = vrot.lane.b32.xlu2 %v2539_v1, %s2399_s10  ;;  %1503 = vrot.lane.b32.xlu1 %v2554_v5, %s2396_s8 }
 0x167   : > { %1409 = vrot.lane.b32.xlu0 %v2551_v4, %s2397_s18 }
 0x168   : > { %v802_v39 = vpop.permute.xlu2 %801  ;;  %v744_v40 = vpop.permute.xlu1 %743 }
 0x169   : > { %v756_v41 = vsel %vm751_vm11, %v744_v40, %v746_v21  ;;  %v742_v43 = vpop.permute.xlu0 %741 }
 0x16a   : > { %770 = vst [vmem:[#allocation2 + $0x288] sm:$0xff] %v756_v41  ;;  %v754_v44 = vsel %vm751_vm11, %v740_v2, %v742_v43  ;;  %v2827_v46 = vsel %vm751_vm11, %v742_v43, %v744_v40 }
 0x16b   : > { %768 = vst [vmem:[#allocation2 + $0x278] sm:$0xff] %v754_v44 }
 0x16e   : > { %1309 = vrot.lane.b32.xlu2 %v2539_v1, %s2400_s11  ;;  %1454 = vrot.lane.b32.xlu1 %v2554_v5, %s2398_s23 }
 0x16f   : > { %1360 = vrot.lane.b32.xlu0 %v2551_v4, %s2399_s10 }
 0x170   : > { %v846_v47 = vpop.permute.xlu2 %845  ;;  %v750_v48 = vpop.permute.xlu1 %749 }
 0x171   : > { %v748_v50 = vpop.permute.xlu0 %747 }
 0x172   : > { %v757_v52 = vsel %vm751_vm11, %v746_v21, %v748_v50  ;;  %v758_v54 = vsel %vm751_vm11, %v748_v50, %v750_v48  ;;  %vm1021_vm11 = vcmask 56320  }
 0x173   : > { %771 = vst [vmem:[#allocation2 + $0x290] sm:$0xff] %v757_v52 }
 0x174   : > { %772 = vst.msk [vmem:[#allocation2 + $0x298] sm:$0xff] %vm217_vm2, %v758_v54 }
 0x176   : > { %1260 = vrot.lane.b32.xlu2 %v2539_v1, %s2401_s17  ;;  %1405 = vrot.lane.b32.xlu1 %v2554_v5, %s2397_s18  ;;  %v1196_v1 = vld [vmem:[%s2525_s9 + $0x10] sm:$0xff] }
 0x177   : > { %1311 = vrot.lane.b32.xlu0 %v2551_v4, %s2400_s11 }
 0x178   : > { %v852_v55 = vpop.permute.xlu2 %851  ;;  %v794_v56 = vpop.permute.xlu1 %793 }
 0x179   : > { %v2845_v57 = vsel %vm805_vm12, %v794_v56, %v796_v32  ;;  %v792_v58 = vpop.permute.xlu0 %791 }
 0x17a   : > { %v2848_v59 = vsel %vm805_vm12, %v790_v0, %v792_v58  ;;  %v2851_v60 = vsel %vm805_vm12, %v792_v58, %v794_v56 }
 0x17e   : > { %1211 = vrot.lane.b32.xlu2 %v1196_v1, %s2402_s20  ;;  %1356 = vrot.lane.b32.xlu1 %v2808_v49, %s2399_s10 }
 0x17f   : > { %1262 = vrot.lane.b32.xlu0 %v2855_v61, %s2401_s17 }
 0x180   : > { %v858_v4 = vpop.permute.xlu2 %857  ;;  %v800_v5 = vpop.permute.xlu1 %799 }
 0x181   : > { %v811_v62 = vsel %vm805_vm12, %v800_v5, %v802_v39  ;;  %v798_v7 = vpop.permute.xlu0 %797 }
 0x182   : > { %825 = vst [vmem:[#allocation2 + $0x2c8] sm:$0xff] %v811_v62  ;;  %v2864_v10 = vsel %vm805_vm12, %v796_v32, %v798_v7  ;;  %v810_v11 = vsel %vm805_vm12, %v798_v7, %v800_v5 }
 0x183   : > { %824 = vst [vmem:[#allocation2 + $0x2c0] sm:$0xff] %v810_v11 }
 0x186   : > { %1162 = vrot.lane.b32.xlu2 %v1196_v1, %s2403_s21  ;;  %1307 = vrot.lane.b32.xlu1 %v2808_v49, %s2400_s11 }
 0x187   : > { %1213 = vrot.lane.b32.xlu0 %v2855_v61, %s2402_s20 }
 0x188   : > { %v902_v12 = vpop.permute.xlu2 %901  ;;  %v844_v14 = vpop.permute.xlu1 %843 }
 0x189   : > { %v2873_v16 = vsel %vm859_vm13, %v844_v14, %v846_v47  ;;  %v804_v2 = vpop.permute.xlu0 %803 }
 0x18a   : > { %v812_v17 = vsel %vm805_vm12, %v802_v39, %v804_v2  ;;  %v2951_v2 = vld [vmem:[%s2525_s9 + $0x28] sm:$0xff]  ;;  %vm1739_vm12 = vcmask 719872  }
 0x18b   : > { %826 = vst.msk [vmem:[#allocation2 + $0x2d0] sm:$0xff] %vm217_vm2, %v812_v17 }
 0x18e   : > { %1113 = vrot.lane.b32.xlu2 %v1196_v1, %s2404_s22  ;;  %1258 = vrot.lane.b32.xlu1 %v2808_v49, %s2401_s17 }
 0x18f   : > { %1164 = vrot.lane.b32.xlu0 %v2855_v61, %s2403_s21 }
 0x190   : > { %v908_v20 = vpop.permute.xlu2 %907  ;;  %v850_v21 = vpop.permute.xlu1 %849 }
 0x191   : > { %v2886_v22 = vsel %vm859_vm13, %v850_v21, %v852_v55  ;;  %v848_v26 = vpop.permute.xlu0 %847 }
 0x192   : > { %v2889_v28 = vsel %vm859_vm13, %v846_v47, %v848_v26  ;;  %v2892_v0 = vsel %vm859_vm13, %v848_v26, %v850_v21 }
 0x196   : > { %1061 = vrot.lane.b32.xlu2 %v2808_v49, %s2405_s24  ;;  %1209 = vrot.lane.b32.xlu1 %v2808_v49, %s2402_s20 }
 0x197   : > { %1115 = vrot.lane.b32.xlu0 %v2855_v61, %s2404_s22 }
 0x198   : > { %v952_v3 = vpop.permute.xlu2 %951  ;;  %v856_v6 = vpop.permute.xlu1 %855 }
 0x199   : > { %v866_v29 = vsel %vm859_vm13, %v856_v6, %v858_v4  ;;  %v854_v30 = vpop.permute.xlu0 %853 }
 0x19a   : > { %880 = vst.msk [vmem:[#allocation2 + $0x308] sm:$0xff] %vm217_vm2, %v866_v29  ;;  %v864_v31 = vsel %vm859_vm13, %v852_v55, %v854_v30  ;;  %v865_v32 = vsel %vm859_vm13, %v854_v30, %v856_v6  ;;  %vm2041_vm13 = vcmask 257024  }
 0x19b   : > { %878 = vst [vmem:[#allocation2 + $0x2f8] sm:$0xff] %v864_v31  ;;  %v1546_v31 = vld [vmem:[#allocation2 + $0x38] sm:$0xff] }
 0x19c   : > { %879 = vst [vmem:[#allocation2 + $0x300] sm:$0xff] %v865_v32 }
 0x19e   : > { %1160 = vrot.lane.b32.xlu2 %v2808_v49, %s2403_s21  ;;  %1509 = vrot.lane.b32.xlu1 %v2905_v33, %s2396_s8 }
 0x19f   : > { %1063 = vrot.lane.b32.xlu0 %v1196_v1, %s2405_s24 }
 0x1a0   : > { %v958_v37 = vpop.permute.xlu2 %957  ;;  %v900_v39 = vpop.permute.xlu1 %899 }
 0x1a1   : > { %v915_v40 = vsel %vm913_vm14, %v900_v39, %v902_v12  ;;  %v898_v41 = vpop.permute.xlu0 %897 }
 0x1a2   : > { %v914_v43 = vsel %vm913_vm14, %v898_v41, %v900_v39 }
 0x1a6   : > { %1460 = vrot.lane.b32.xlu2 %v2905_v33, %s2398_s23  ;;  %1009 = vrot.lane.b32.xlu1 %v1196_v1, %s2406_s25 }
 0x1a7   : > { %1007 = vrot.lane.b32.xlu0 %v2808_v49, %s2406_s25 }
 0x1a8   : > { %v964_v44 = vpop.permute.xlu2 %963  ;;  %v906_v47 = vpop.permute.xlu1 %905 }
 0x1a9   : > { %v918_v48 = vsel %vm913_vm14, %v906_v47, %v908_v20  ;;  %v904_v50 = vpop.permute.xlu0 %903 }
 0x1aa   : > { %932 = vst [vmem:[#allocation2 + $0x330] sm:$0xff] %v918_v48  ;;  %v2921_v52 = vsel %vm913_vm14, %v902_v12, %v904_v50  ;;  %v2924_v54 = vsel %vm913_vm14, %v904_v50, %v906_v47  ;;  %v1577_v48 = vld [vmem:[#allocation2 + $0x130] sm:$0xff] }
 0x1ae   : > { %1059 = vrot.lane.b32.xlu2 %v2878_v19, %s2405_s24  ;;  %1411 = vrot.lane.b32.xlu1 %v2905_v33, %s2397_s18 }
 0x1af   : > { %1111 = vrot.lane.b32.xlu0 %v2808_v49, %s2404_s22 }
 0x1b0   : > { %v2932_v55 = vpop.permute.xlu2 %1507  ;;  %v912_v56 = vpop.permute.xlu1 %911 }
 0x1b1   : > { %v910_v58 = vpop.permute.xlu0 %909 }
 0x1b2   : > { %v919_v1 = vsel %vm913_vm14, %v908_v20, %v910_v58  ;;  %v920_v4 = vsel %vm913_vm14, %v910_v58, %v912_v56  ;;  %v1563_v56 = vld [vmem:[#allocation2 + $0xc0] sm:$0xff]  ;;  %v1556_v58 = vld [vmem:[#allocation2 + $0x88] sm:$0xff] }
 0x1b3   : > { %933 = vst [vmem:[#allocation2 + $0x338] sm:$0xff] %v919_v1 }
 0x1b4   : > { %934 = vst.msk [vmem:[#allocation2 + $0x340] sm:$0xff] %vm217_vm2, %v920_v4 }
 0x1b6   : > { %1313 = vrot.lane.b32.xlu2 %v2905_v33, %s2400_s11  ;;  %1005 = vrot.lane.b32.xlu1 %v2878_v19, %s2406_s25 }
 0x1b7   : > { %1362 = vrot.lane.b32.xlu0 %v2905_v33, %s2399_s10 }
 0x1b8   : > { %v2943_v5 = vpop.permute.xlu2 %1407  ;;  %v956_v62 = vpop.permute.xlu1 %955 }
 0x1b9   : > { %v2946_v7 = vsel %vm967_vm15, %v956_v62, %v958_v37  ;;  %v954_v11 = vpop.permute.xlu0 %953 }
 0x1ba   : > { %v968_v12 = vsel %vm967_vm15, %v952_v3, %v954_v11  ;;  %v969_v14 = vsel %vm967_vm15, %v954_v11, %v956_v62 }
 0x1bb   : > { %1742 = vmatpush.msra.mxu0 %v968_v12  ;;  %1782 = vmatpush.msra.mxu2 %v969_v14 }
 0x1bd   : > { %1743 = vmatpush.msra.mxu0 %v914_v43  ;;  %1783 = vmatpush.msra.mxu2 %v915_v40  ;;  %v3047_v43 = vld [vmem:[%s2525_s9 + $0x38] sm:$0xff] }
 0x1be   : > { %1462 = vrot.lane.b32.xlu2 %v2951_v2, %s2398_s23  ;;  %1264 = vrot.lane.b32.xlu1 %v2905_v33, %s2401_s17 }
 0x1bf   : > { %1511 = vrot.lane.b32.xlu0 %v2951_v2, %s2396_s8  ;;  %1744 = vmatpush.msra.mxu0 %v2873_v16 }
 0x1c0   : > { %v2960_v17 = vpop.permute.xlu2 %1358  ;;  %v962_v20 = vpop.permute.xlu1 %961  ;;  %1784 = vmatpush.msra.mxu2 %v2889_v28  ;;  %v1554_v28 = vld [vmem:[#allocation2 + $0x78] sm:$0xff] }
 0x1c1   : > { %v973_v21 = vsel %vm967_vm15, %v962_v20, %v964_v44  ;;  %v960_v26 = vpop.permute.xlu0 %959  ;;  %1745 = vmatpush.msra.mxu0 %v2848_v59 }
 0x1c2   : > { %987 = vst [vmem:[#allocation2 + $0x370] sm:$0xff] %v973_v21  ;;  %v2966_v3 = vsel %vm967_vm15, %v958_v37, %v960_v26  ;;  %v2969_v6 = vsel %vm967_vm15, %v960_v26, %v962_v20  ;;  %1785 = vmatpush.msra.mxu2 %v2851_v60  ;;  %v1547_v37 = vld [vmem:[#allocation2 + $0x40] sm:$0xff] }
 0x1c3   : > { %1746 = vmatpush.msra.mxu0 %v2816_v38 }
 0x1c4   : > { %1786 = vmatpush.msra.mxu2 %v2813_v35 }
 0x1c5   : > { %1747 = vmatpush.msra.mxu0 %v2776_v18 }
 0x1c6   : > { %1166 = vrot.lane.b32.xlu2 %v2905_v33, %s2403_s21  ;;  %1413 = vrot.lane.b32.xlu1 %v2951_v2, %s2397_s18 }
 0x1c7   : > { %1215 = vrot.lane.b32.xlu0 %v2905_v33, %s2402_s20  ;;  %1787 = vmatpush.msra.mxu2 %v2790_v27  ;;  %v1568_v27 = vld [vmem:[#allocation2 + $0xe8] sm:$0xff] }
 0x1c8   : > { %v2982_v59 = vpop.permute.xlu2 %1309  ;;  %v1506_v60 = vpop.permute.xlu1 %1505  ;;  %1748 = vmatpush.msra.mxu0 %v2755_v8  ;;  %v1567_v8 = vld [vmem:[#allocation2 + $0xe0] sm:$0xff] }
 0x1c9   : > { %v1519_v18 = vsel %vm1517_vm0, %v1506_v60, %v2932_v55  ;;  %v966_v35 = vpop.permute.xlu0 %965  ;;  %1788 = vmatpush.msra.mxu2 %v2758_v9  ;;  %v3011_v9 = vld [vmem:[%s2525_s9 + $0x30] sm:$0xff] }
 0x1ca   : > { %v974_v38 = vsel %vm967_vm15, %v964_v44, %v966_v35  ;;  %1749 = vmatpush.msra.mxu0 %v2730_v45  ;;  %1807 = vmatpush.msra.mxu3 %v1519_v18 }
 0x1cb   : > { %988 = vst.msk [vmem:[#allocation2 + $0x378] sm:$0xff] %vm217_vm2, %v974_v38  ;;  %1789 = vmatpush.msra.mxu2 %v2741_v53 }
 0x1cc   : > { %1750 = vmatpush.msra.mxu0 %v2715_v36 }
 0x1cd   : > { %1790 = vmatpush.msra.mxu2 %v2712_v34 }
 0x1ce   : > { %1315 = vrot.lane.b32.xlu2 %v2951_v2, %s2400_s11  ;;  %1117 = vrot.lane.b32.xlu1 %v2905_v33, %s2404_s22 }
 0x1cf   : > { %1364 = vrot.lane.b32.xlu0 %v2951_v2, %s2399_s10  ;;  %1751 = vmatpush.msra.mxu0 %v2691_v24  ;;  %v1560_v24 = vld [vmem:[#allocation2 + $0xa8] sm:$0xff] }
 0x1d0   : > { %v3001_v45 = vpop.permute.xlu2 %1260  ;;  %v3003_v53 = vpop.permute.xlu1 %1458  ;;  %1791 = vmatpush.msra.mxu2 %v2694_v25 }
 0x1d1   : > { %v1457_v36 = vpop.permute.xlu0 %1456  ;;  %1752 = vmatpush.msra.mxu0 %v2666_v63  ;;  %v1561_v63 = vld [vmem:[#allocation2 + $0xb0] sm:$0xff] }
 0x1d2   : > { %v1470_v34 = vsel %vm1468_vm1, %v1457_v36, %v3003_v53  ;;  %1792 = vmatpush.msra.mxu2 %v2676_v13  ;;  %v1553_v13 = vld [vmem:[#allocation2 + $0x70] sm:$0xff] }
 0x1d3   : > { %1753 = vmatpush.msra.mxu0 %v1567_v8  ;;  %1808 = vmatpush.msra.mxu3 %v1470_v34 }
 0x1d4   : > { %1793 = vmatpush.msra.mxu2 %v1568_v27 }
 0x1d5   : > { %1754 = vmatpush.msra.mxu0 %v1560_v24 }
 0x1d6   : > { %1266 = vrot.lane.b32.xlu2 %v2951_v2, %s2401_s17  ;;  %1513 = vrot.lane.b32.xlu1 %v3011_v9, %s2396_s8 }
 0x1d7   : > { %1065 = vrot.lane.b32.xlu0 %v2855_v61, %s2405_s24  ;;  %1794 = vmatpush.msra.mxu2 %v1561_v63 }
 0x1d8   : > { %v3019_v25 = vpop.permute.xlu2 %1211  ;;  %v1504_v16 = vpop.permute.xlu1 %1503  ;;  %1755 = vmatpush.msra.mxu0 %v1553_v13 }
 0x1d9   : > { %v1518_v29 = vsel %vm1517_vm0, %v1504_v16, %v1506_v60  ;;  %v3022_v30 = vpop.permute.xlu0 %1409  ;;  %1795 = vmatpush.msra.mxu2 %v1554_v28 }
 0x1da   : > { %v1421_v32 = vsel %vm1419_vm3, %v2943_v5, %v3022_v30  ;;  %1756 = vmatpush.msra.mxu0 %v1546_v31  ;;  %1767 = vmatpush.msra.mxu1 %v1518_v29 }
 0x1db   : > { %1796 = vmatpush.msra.mxu2 %v1547_v37  ;;  %1809 = vmatpush.msra.mxu3 %v1421_v32 }
 0x1dc   : > { %1757 = vmatpush.msra.mxu0 %v2878_v19 }
 0x1dd   : > { %1797 = vmatpush.msra.mxu2 %v2808_v49 }
 0x1de   : > { %1862 = vmatpush.msrb.mxu0 %v2966_v3  ;;  %1217 = vrot.lane.b32.xlu2 %v2951_v2, %s2402_s20 }
 0x1df   : > { %1464 = vrot.lane.b32.xlu1 %v3011_v9, %s2398_s23  ;;  %1011 = vrot.lane.b32.xlu0 %v2855_v61, %s2406_s25 }
 0x1e0   : > { %1863 = vmatpush.msrb.mxu0 %v2924_v54  ;;  %v3037_v39 = vpop.permute.xlu2 %1162  ;;  %v1455_v40 = vpop.permute.xlu1 %1454  ;;  %v1570_v54 = vld [vmem:[#allocation2 + $0xf8] sm:$0xff] }
 0x1e1   : > { %v1469_v19 = vsel %vm1468_vm1, %v1455_v40, %v1457_v36  ;;  %v3040_v41 = vpop.permute.xlu0 %1360 }
 0x1e2   : > { %1864 = vmatpush.msrb.mxu0 %v2886_v22  ;;  %v1372_v49 = vsel %vm1370_vm4, %v2960_v17, %v3040_v41  ;;  %1768 = vmatpush.msra.mxu1 %v1469_v19 }
 0x1e3   : > { %1810 = vmatpush.msra.mxu3 %v1372_v49 }
 0x1e4   : > { %1865 = vmatpush.msrb.mxu0 %v2864_v10 }
 0x1e6   : > { %1866 = vmatpush.msrb.mxu0 %v2827_v46  ;;  %1515 = vrot.lane.b32.xlu2 %v3047_v43, %s2396_s8 }
 0x1e7   : > { %1168 = vrot.lane.b32.xlu1 %v2951_v2, %s2403_s21  ;;  %1415 = vrot.lane.b32.xlu0 %v3011_v9, %s2397_s18 }
 0x1e8   : > { %1867 = vmatpush.msrb.mxu0 %v2787_v23  ;;  %v3058_v61 = vpop.permute.xlu2 %1113  ;;  %v1406_v22 = vpop.permute.xlu1 %1405  ;;  %v1584_v23 = vld [vmem:[#allocation2 + $0x168] sm:$0xff] }
 0x1e9   : > { %v1420_v10 = vsel %vm1419_vm3, %v1406_v22, %v2943_v5  ;;  %v3062_v44 = vpop.permute.xlu0 %1311  ;;  %v1549_v5 = vld [vmem:[#allocation2 + $0x50] sm:$0xff] }
 0x1ea   : > { %1868 = vmatpush.msrb.mxu0 %v2766_v15  ;;  %v1323_v46 = vsel %vm1321_vm5, %v2982_v59, %v3062_v44  ;;  %1769 = vmatpush.msra.mxu1 %v1420_v10 }
 0x1eb   : > { %1811 = vmatpush.msra.mxu3 %v1323_v46  ;;  %v1618_v46 = vld [vmem:[#allocation2 + $0x278] sm:$0xff] }
 0x1ec   : > { %1869 = vmatpush.msrb.mxu0 %v2738_v51 }
 0x1ee   : > { %1870 = vmatpush.msrb.mxu0 %v2724_v42  ;;  %1466 = vrot.lane.b32.xlu2 %v3047_v43, %s2398_s23 }
 0x1ef   : > { %1119 = vrot.lane.b32.xlu1 %v2951_v2, %s2404_s22  ;;  %1366 = vrot.lane.b32.xlu0 %v3011_v9, %s2399_s10 }
 0x1f0   : > { %1871 = vmatpush.msrb.mxu0 %v1584_v23  ;;  %v3076_v15 = vpop.permute.xlu2 %1061  ;;  %v1357_v47 = vpop.permute.xlu1 %1356  ;;  %v207_v23 = vld [vmem:[%s2525_s9 + $0x18] sm:$0xff] }
 0x1f1   : > { %v1371_v51 = vsel %vm1370_vm4, %v1357_v47, %v2960_v17  ;;  %v3080_v42 = vpop.permute.xlu0 %1262  ;;  %v1611_v47 = vld [vmem:[#allocation2 + $0x240] sm:$0xff] }
 0x1f2   : > { %1872 = vmatpush.msrb.mxu0 %v1577_v48  ;;  %v1274_v50 = vsel %vm1272_vm6, %v3001_v45, %v3080_v42  ;;  %1770 = vmatpush.msra.mxu1 %v1371_v51  ;;  %v1604_v48 = vld [vmem:[#allocation2 + $0x208] sm:$0xff] }
 0x1f3   : > { %1812 = vmatpush.msra.mxu3 %v1274_v50 }
 0x1f4   : > { %1873 = vmatpush.msrb.mxu0 %v1570_v54 }
 0x1f6   : > { %1874 = vmatpush.msrb.mxu0 %v1563_v56  ;;  %1417 = vrot.lane.b32.xlu2 %v3047_v43, %s2397_s18  ;;  %s2055_s18 = scalar_lea.hbm %s3383_s3, %s2161_s7 }
 0x1f7   : > { %1067 = vrot.lane.b32.xlu1 %v2905_v33, %s2405_s24  ;;  %1317 = vrot.lane.b32.xlu0 %v3011_v9, %s2400_s11 }
 0x1f8   : > { %1875 = vmatpush.msrb.mxu0 %v1556_v58  ;;  %v1161_v1 = vpop.permute.xlu2 %1160  ;;  %v1308_v4 = vpop.permute.xlu1 %1307 }
 0x1f9   : > { %v1175_v62 = vsel %vm1174_vm7, %v1161_v1, %v3037_v39  ;;  %v1322_v11 = vsel %vm1321_vm5, %v1308_v4, %v2982_v59  ;;  %v3095_v12 = vpop.permute.xlu0 %1213  ;;  %v1590_v1 = vld [vmem:[#allocation2 + $0x198] sm:$0xff]  ;;  %v1583_v4 = vld [vmem:[#allocation2 + $0x160] sm:$0xff] }
 0x1fa   : > { %1876 = vmatpush.msrb.mxu0 %v1549_v5  ;;  %v1225_v14 = vsel %vm1223_vm8, %v3019_v25, %v3095_v12  ;;  %1771 = vmatpush.msra.mxu1 %v1322_v11  ;;  %v1576_v5 = vld [vmem:[#allocation2 + $0x128] sm:$0xff] }
 0x1fb   : > { %1813 = vmatpush.msra.mxu3 %v1225_v14  ;;  %v1569_v14 = vld [vmem:[#allocation2 + $0xf0] sm:$0xff] }
 0x1fc   : > { %1877 = vmatpush.msrb.mxu0 %v207_v23 }
 0x1fe   : > { %1368 = vrot.lane.b32.xlu2 %v3047_v43, %s2399_s10  ;;  %s2059_s10 = sshll.u32 %s2055_s18, 4  ;;  %s2060_s10 = int_to_ptr.hbm [resolvable:$true] %s2059_s10 }
 0x1ff   : > { %1013 = vrot.lane.b32.xlu1 %v2905_v33, %s2406_s25  ;;  %1268 = vrot.lane.b32.xlu0 %v3011_v9, %s2401_s17 }
 0x200   : > { %v1461_v17 = vpop.permute.xlu2 %1460  ;;  %v1259_v20 = vpop.permute.xlu1 %1258 }
 0x201   : > { %v1471_v21 = vsel %vm1468_vm1, %v3003_v53, %v1461_v17  ;;  %v1273_v26 = vsel %vm1272_vm6, %v1259_v20, %v3001_v45  ;;  %v1165_v3 = vpop.permute.xlu0 %1164 }
 0x202   : > { %v1176_v59 = vsel %vm1174_vm7, %v3037_v39, %v1165_v3  ;;  %1772 = vmatpush.msra.mxu1 %v1273_v26  ;;  %v1538_v39 = vld [vmem:[#allocation6] sm:$0xff]  ;;  %v1555_v26 = vld [vmem:[#allocation2 + $0x80] sm:$0xff] }
 0x203   : > { %1814 = vmatpush.msra.mxu3 %v1176_v59  ;;  %1735 = vst [vmem:[#allocation1] ss:$2 sm:$0xff] %v1538_v39  ;;  %v1606_v39 = vld [vmem:[#allocation2 + $0x218] sm:$0xff] }
 0x206   : > { %1170 = vrot.lane.b32.xlu2 %v3011_v9, %s2403_s21 }
 0x207   : > { %1319 = vrot.lane.b32.xlu1 %v3047_v43, %s2400_s11  ;;  %1219 = vrot.lane.b32.xlu0 %v3011_v9, %s2402_s20  ;;  %s2044_s11 = scalar_lea.sflag [#allocation5], %s2521_s4 }
 0x208   : > { %v1060_v33 = vpop.permute.xlu2 %1059  ;;  %v1210_v60 = vpop.permute.xlu1 %1209 }
 0x209   : > { %v1076_v18 = vsel %vm1075_vm9, %v1060_v33, %v3076_v15  ;;  %v1224_v35 = vsel %vm1223_vm8, %v1210_v60, %v3019_v25  ;;  %v3122_v38 = vpop.permute.xlu0 %1115 }
 0x20a   : > { %v1127_v45 = vsel %vm1125_vm10, %v3058_v61, %v3122_v38  ;;  %1773 = vmatpush.msra.mxu1 %v1224_v35 }
 0x20b   : > { %1815 = vmatpush.msra.mxu3 %v1127_v45 }
 0x20c   : > { %1774 = vmatpush.msra.mxu1 %v1175_v62 }
 0x20e   : > { %1221 = vrot.lane.b32.xlu2 %v3047_v43, %s2402_s20 }
 0x20f   : > { %1121 = vrot.lane.b32.xlu1 %v3011_v9, %s2404_s22  ;;  %1270 = vrot.lane.b32.xlu0 %v3047_v43, %s2401_s17  ;;  %s2322_s17 = sshra.s32 %s2060_s10, 4  ;;  %s2323_s17 = int_to_ptr.hbm [resolvable:$true] %s2322_s17 }
 0x210   : > { %v1314_v53 = vpop.permute.xlu2 %1313  ;;  %v1510_v36 = vpop.permute.xlu1 %1509  ;;  %s2324_s20 = scalar_lea.hbm %s2323_s17, 28  ;;  %p2329_p9 = scmp.lt.s32.totalorder %s2323_s17, %s3383_s3 }
 0x211   : > { %v1324_v34 = vsel %vm1321_vm5, %v3062_v44, %v1314_v53  ;;  %v1520_v8 = vsel %vm1517_vm0, %v2932_v55, %v1510_v36  ;;  %v3137_v27 = vpop.permute.xlu0 %1063  ;;  %p2325_p1 = scmp.ne.s32.totalorder %s2323_s17, %s2324_s20 }
 0x212   : > { %v1077_v24 = vsel %vm1075_vm9, %v3076_v15, %v3137_v27  ;;  %v3204_v15 = vld.sshfl [vmem:[#allocation1] sm:$0xff pattern:$0x75316420] }
 0x213   : > { %1816 = vmatpush.msra.mxu3 %v1077_v24  ;;  %1798 = vmatmul.f32.vlgmr.msra.gmra.mxu2 %v3204_v15  ;;  %v1641_v24 = vld [vmem:[#allocation2 + $0x330] sm:$0xff]  ;;  %p2326_p4 = pnand %p2325_p1, %p2495_p7 }
 0x214   : > { %1758 = vmatmul.f32.vlgmr.msra.gmra.mxu0 %v3204_v15 }
 0x215   : > { %p2327_p8 = pneg %p2326_p4 }
 0x216   : > { %1015 = vrot.lane.b32.xlu2 %v2951_v2, %s2406_s25 }
 0x217   : > { %1172 = vrot.lane.b32.xlu1 %v3047_v43, %s2403_s21  ;;  %1069 = vrot.lane.b32.xlu0 %v2951_v2, %s2405_s24 }
 0x218   : > { %v3148_v63 = vpop.permute.xlu2 %1462  ;;  %v3150_v55 = vpop.permute.xlu1 %1009 }
 0x219   : > { %v1472_v13 = vsel %vm1468_vm1, %v1461_v17, %v3148_v63  ;;  %v1008_v25 = vpop.permute.xlu0 %1007 }
 0x21a   : > { %v1023_v16 = vsel %vm1021_vm11, %v1008_v25, %v3150_v55 }
 0x21b   : > { %1817 = vmatpush.msra.mxu3 %v1023_v16 }
 0x21c   : > { %1878 = vmatmul.f32.vlgmr.msrb.gmra.mxu0 %v3204_v15 }
 0x21d   : > { %1847 = vmatpush.msrb.mxu3 %v1520_v8 }
 0x21e   : > { %1073 = vrot.lane.b32.xlu2 %v3047_v43, %s2405_s24 }
 0x21f   : > { %1071 = vrot.lane.b32.xlu1 %v3011_v9, %s2405_s24  ;;  %1848 = vmatpush.msrb.mxu3 %v1471_v21  ;;  %v1562_v21 = vld [vmem:[#allocation2 + $0xb8] sm:$0xff] }
 0x220   : > { %1123 = vrot.lane.b32.xlu0 %v3047_v43, %s2404_s22  ;;  %v3162_v2 = vpop.permute.xlu2 %1166  ;;  %v1412_v28 = vpop.permute.xlu1 %1411  ;;  %s2328_s22 = scalar_lea.hbm %s3383_s3, 56 }
 0x221   : > { %v1177_v29 = vsel %vm1174_vm7, %v1165_v3, %v3162_v2  ;;  %v1422_v31 = vsel %vm1419_vm3, %v3022_v30, %v1412_v28  ;;  %v1112_v32 = vpop.permute.xlu0 %1111  ;;  %v1548_v3 = vld [vmem:[#allocation2 + $0x48] sm:$0xff]  ;;  %p2330_p10 = scmp.lt.s32.totalorder %s2328_s22, %s2324_s20 }
 0x222   : > { %v1126_v37 = vsel %vm1125_vm10, %v1112_v32, %v3058_v61  ;;  %1849 = vmatpush.msrb.mxu3 %v1422_v31  ;;  %v1620_v32 = vld [vmem:[#allocation2 + $0x288] sm:$0xff] }
 0x223   : > { %1775 = vmatpush.msra.mxu1 %v1126_v37  ;;  %v1613_v37 = vld [vmem:[#allocation2 + $0x250] sm:$0xff]  ;;  %p2331_p2 = por %p2330_p10, %p2329_p9 }
 0x225   : > { %1776 = vmatpush.msra.mxu1 %v1076_v18  ;;  %p2332_p11 = pnand %p2331_p2, %p2327_p8 }
 0x227   : > { %1019 = vrot.lane.b32.xlu1 %v3047_v43, %s2406_s25  ;;  %v3188_v43 = vld.sshfl [vmem:[#allocation1 + $0x8] sm:$0xff pattern:$0x75316420] }
 0x228   : > { %1017 = vrot.lane.b32.xlu0 %v3011_v9, %s2406_s25  ;;  %v3174_v40 = vpop.permute.xlu2 %1315  ;;  %v1006_v19 = vpop.permute.xlu1 %1005  ;;  %v3186_v9 = vld [vmem:[%s2525_s9 + $0x10] sm:$0xff]  ;;  %2148 = vmatmul.msk.f32.vlgmr.msra.gmra.mxu3 %vm1739_vm12, %v3188_v43 }
 0x229   : > { %v3178_v30 = vsel %vm1321_vm5, %v1314_v53, %v3174_v40  ;;  %v1022_v49 = vsel %vm1021_vm11, %v1006_v19, %v1008_v25  ;;  %v1363_v61 = vpop.permute.xlu0 %1362 }
 0x22a   : > { %v1373_v22 = vsel %vm1370_vm4, %v3040_v41, %v1363_v61  ;;  %1777 = vmatpush.msra.mxu1 %v1022_v49 }
 0x22b   : > { %1850 = vmatpush.msrb.mxu3 %v1373_v22  ;;  %2147 = vmatmul.msk.f32.vlgmr.msra.gmra.mxu1 %vm1739_vm12, %v3188_v43  ;;  %v1599_v22 = vld [vmem:[#allocation2 + $0x1e0] sm:$0xff] }
 0x22c   : > { %1822 = vmatpush.msrb.mxu1 %v2946_v7 }
 0x22d   : > { %1851 = vmatpush.msrb.mxu3 %v1324_v34 }
 0x22e   : > { %1823 = vmatpush.msrb.mxu1 %v2921_v52 }
 0x230   : > { %1824 = vmatpush.msrb.mxu1 %v2892_v0  ;;  %v3193_v10 = vpop.permute.xlu2 %1266  ;;  %v1265_v41 = vpop.permute.xlu1 %1264 }
 0x231   : > { %v1275_v52 = vsel %vm1272_vm6, %v3080_v42, %v1265_v41  ;;  %v1276_v7 = vsel %vm1272_vm6, %v1265_v41, %v3193_v10  ;;  %v1512_v44 = vpop.permute.xlu0 %1511  ;;  %v1597_v42 = vld [vmem:[#allocation2 + $0x1d0] sm:$0xff] }
 0x232   : > { %1825 = vmatpush.msrb.mxu1 %v2845_v57  ;;  %v1521_v0 = vsel %vm1517_vm0, %v1510_v36, %v1512_v44  ;;  %1852 = vmatpush.msrb.mxu3 %v1275_v52  ;;  %v1592_v52 = vld [vmem:[#allocation2 + $0x1a8] sm:$0xff] }
 0x233   : > { %1887 = vmatpush.msrb.mxu2 %v1521_v0 }
 0x234   : > { %1826 = vmatpush.msrb.mxu1 %v1618_v46 }
 0x235   : > { %1888 = vmatpush.msrb.mxu2 %v1472_v13  ;;  %v3251_v13 = vld [vmem:[%s2525_s9 + $0x20] sm:$0xff] }
 0x236   : > { %1827 = vmatpush.msrb.mxu1 %v1611_v47 }
 0x238   : > { %1828 = vmatpush.msrb.mxu1 %v1604_v48  ;;  %v3208_v57 = vpop.permute.xlu2 %1217  ;;  %v3210_v51 = vpop.permute.xlu1 %1413  ;;  %v1571_v48 = vld [vmem:[#allocation2 + $0x100] sm:$0xff] }
 0x239   : > { %v1423_v50 = vsel %vm1419_vm3, %v1412_v28, %v3210_v51  ;;  %v1216_v54 = vpop.permute.xlu0 %1215 }
 0x23a   : > { %1829 = vmatpush.msrb.mxu1 %v1597_v42  ;;  %v1226_v56 = vsel %vm1223_vm8, %v3095_v12, %v1216_v54  ;;  %v1227_v58 = vsel %vm1223_vm8, %v1216_v54, %v3208_v57  ;;  %1889 = vmatpush.msrb.mxu2 %v1423_v50  ;;  %v1564_v42 = vld [vmem:[#allocation2 + $0xc8] sm:$0xff]  ;;  %v1557_v50 = vld [vmem:[#allocation2 + $0x90] sm:$0xff]  ;;  %v1550_v54 = vld [vmem:[#allocation2 + $0x58] sm:$0xff] }
 0x23b   : > { %1853 = vmatpush.msrb.mxu3 %v1226_v56 }
 0x23c   : > { %1830 = vmatpush.msrb.mxu1 %v1590_v1 }
 0x23d   : > { %1854 = vmatpush.msrb.mxu3 %v1177_v29  ;;  %v1627_v29 = vld [vmem:[#allocation2 + $0x2c0] sm:$0xff] }
 0x23e   : > { %1831 = vmatpush.msrb.mxu1 %v1583_v4 }
 0x240   : > { %1832 = vmatpush.msrb.mxu1 %v1576_v5  ;;  %v1516_v62 = vpop.permute.xlu2 %1515  ;;  %v3219_v11 = vpop.permute.xlu1 %1117 }
 0x241   : > { %1537 = vst.msk [vmem:[#allocation2 + $0x5e0] sm:$0xff] %vm217_vm2, %v1516_v62  ;;  %v1128_v12 = vsel %vm1125_vm10, %v3122_v38, %v3219_v11  ;;  %v3225_v17 = vpop.permute.xlu0 %1364 }
 0x242   : > { %1833 = vmatpush.msrb.mxu1 %v1569_v14  ;;  %v1374_v20 = vsel %vm1370_vm4, %v1363_v61, %v3225_v17  ;;  %1855 = vmatpush.msrb.mxu3 %v1128_v12  ;;  %v1642_v12 = vld [vmem:[#allocation2 + $0x338] sm:$0xff] }
 0x243   : > { %1890 = vmatpush.msrb.mxu2 %v1374_v20 }
 0x244   : > { %1834 = vmatpush.msrb.mxu1 %v1562_v21 }
 0x245   : > { %1891 = vmatpush.msrb.mxu2 %v3178_v30 }
 0x246   : > { %1835 = vmatpush.msrb.mxu1 %v1555_v26 }
 0x247   : > { %1892 = vmatpush.msrb.mxu2 %v1276_v7  ;;  %v1585_v7 = vld [vmem:[#allocation2 + $0x170] sm:$0xff] }
 0x248   : > { %1836 = vmatpush.msrb.mxu1 %v1548_v3  ;;  %v1467_v59 = vpop.permute.xlu2 %1466  ;;  %v1514_v33 = vpop.permute.xlu1 %1513 }
 0x249   : > { %1488 = vst.msk [vmem:[#allocation2 + $0x5a8] sm:$0xff] %vm217_vm2, %v1467_v59  ;;  %v1522_v60 = vsel %vm1517_vm0, %v1512_v44, %v1514_v33  ;;  %v1523_v18 = vsel %vm1517_vm0, %v1514_v33, %v1516_v62  ;;  %v3233_v35 = vpop.permute.xlu0 %1065  ;;  %1893 = vmatpush.msrb.mxu2 %v1227_v58  ;;  %v1578_v44 = vld [vmem:[#allocation2 + $0x138] sm:$0xff]  ;;  %v1727_v62 = vld [vmem:[#allocation2 + $0x5e0] sm:$0xff] }
 0x24a   : > { %1837 = vmatpush.msrb.mxu1 %v3186_v9  ;;  %v1078_v38 = vsel %vm1075_vm9, %v3137_v27, %v3233_v35  ;;  %1967 = vmatpush.msra.mxu0 %v1523_v18  ;;  %v1621_v18 = vld [vmem:[#allocation2 + $0x290] sm:$0xff] }
 0x24b   : > { %1856 = vmatpush.msrb.mxu3 %v1078_v38  ;;  %1838 = vmatmul.f32.vlgmr.msrb.gmra.mxu1 %v3204_v15  ;;  %v1728_v38 = vld [vmem:[%s3382_s2] sm:$0xf] }
 0x24c   : > { %1927 = vmatpush.msra.mxu1 %v1522_v60 }
 0x250   : > { %v1418_v45 = vpop.permute.xlu2 %1417  ;;  %v1720_v14 = vld [vmem:[#allocation2 + $0x5a8] sm:$0xff] }
 0x251   : > { %v1465_v53 = vpop.permute.xlu1 %1464  ;;  %1439 = vst.msk [vmem:[#allocation2 + $0x570] sm:$0xff] %vm217_vm2, %v1418_v45  ;;  %v3244_v8 = vpop.permute.xlu0 %1011 }
 0x252   : > { %v1473_v36 = vsel %vm1468_vm1, %v3148_v63, %v1465_v53  ;;  %v1474_v34 = vsel %vm1468_vm1, %v1465_v53, %v1467_v59  ;;  %v1024_v27 = vsel %vm1021_vm11, %v3150_v55, %v3244_v8  ;;  %v1634_v63 = vld [vmem:[#allocation2 + $0x2f8] sm:$0xff]  ;;  %v1628_v59 = vld [vmem:[#allocation2 + $0x2c8] sm:$0xff] }
 0x253   : > { %1928 = vmatpush.msra.mxu1 %v1473_v36  ;;  %1968 = vmatpush.msra.mxu0 %v1474_v34  ;;  %v1614_v53 = vld [vmem:[#allocation2 + $0x258] sm:$0xff] }
 0x254   : > { %1857 = vmatpush.msrb.mxu3 %v1024_v27 }
 0x255   : > { %2149 = vmatmul.msk.f32.vlgmr.msrb.gmra.mxu3 %vm1739_vm12, %v3188_v43 }
 0x256   : > { %1902 = vmatpush.msra.mxu3 %v2969_v6 }
 0x258   : > { %1903 = vmatpush.msra.mxu3 %v1641_v24  ;;  %v1369_v25 = vpop.permute.xlu2 %1368  ;;  %v1600_v24 = vld [vmem:[#allocation2 + $0x1e8] sm:$0xff] }
 0x259   : > { %v1169_v16 = vpop.permute.xlu1 %1168  ;;  %1390 = vst.msk [vmem:[#allocation2 + $0x538] sm:$0xff] %vm217_vm2, %v1369_v25  ;;  %v1416_v28 = vpop.permute.xlu0 %1415 }
 0x25a   : > { %1904 = vmatpush.msra.mxu3 %v1634_v63  ;;  %v1178_v55 = vsel %vm1174_vm7, %v3162_v2, %v1169_v16  ;;  %v1424_v6 = vsel %vm1419_vm3, %v3210_v51, %v1416_v28  ;;  %v1425_v31 = vsel %vm1419_vm3, %v1416_v28, %v1418_v45  ;;  %v209_v45 = vld [vmem:[%s2525_s9 + $0x28] sm:$0xff] }
 0x25b   : > { %1894 = vmatpush.msrb.mxu2 %v1178_v55  ;;  %1929 = vmatpush.msra.mxu1 %v1424_v6  ;;  %v1593_v63 = vld [vmem:[#allocation2 + $0x1b0] sm:$0xff]  ;;  %v210_v55 = vld [vmem:[%s2525_s9 + $0x30] sm:$0xff]  ;;  %s2160_s9 = smul.u32 28, %s2521_s4 }
 0x25c   : > { %1905 = vmatpush.msra.mxu3 %v1627_v29  ;;  %1969 = vmatpush.msra.mxu0 %v1425_v31  ;;  %218 = vst.msk [vmem:[#allocation2 + $0x30] sm:$0xff] %vm217_vm2, %v210_v55  ;;  %v1572_v31 = vld [vmem:[#allocation2 + $0x108] sm:$0xff] }
 0x25d   : > { %s3338_s5 = scalar_lea.vmem [#allocation8], %s2160_s9 }
 0x25e   : > { %1906 = vmatpush.msra.mxu3 %v1620_v32  ;;  %s2057_s23 = sshll.u32 %s3338_s5, 4  ;;  %s2058_s23 = int_to_ptr.vmem [resolvable:$true] %s2057_s23 }
 0x260   : > { %1907 = vmatpush.msra.mxu3 %v1613_v37  ;;  %v3261_v19 = vpop.permute.xlu2 %1170  ;;  %v1706_v20 = vld [vmem:[#allocation2 + $0x538] sm:$0xff] }
 0x261   : > { %v3263_v30 = vpop.permute.xlu1 %1119  ;;  %v3267_v2 = vsel %vm1174_vm7, %v1169_v16, %v3261_v19  ;;  %v1367_v61 = vpop.permute.xlu0 %1366  ;;  %v1579_v16 = vld [vmem:[#allocation2 + $0x140] sm:$0xff] }
 0x262   : > { %1908 = vmatpush.msra.mxu3 %v1606_v39  ;;  %v1129_v49 = vsel %vm1125_vm10, %v3219_v11, %v3263_v30  ;;  %v1375_v9 = vsel %vm1370_vm4, %v3225_v17, %v1367_v61  ;;  %v1376_v41 = vsel %vm1370_vm4, %v1367_v61, %v1369_v25  ;;  %v1649_v11 = vld [vmem:[#allocation2 + $0x370] sm:$0xff]  ;;  %v1586_v25 = vld [vmem:[#allocation2 + $0x178] sm:$0xff] }
 0x263   : > { %1895 = vmatpush.msrb.mxu2 %v1129_v49  ;;  %1930 = vmatpush.msra.mxu1 %v1375_v9  ;;  %v1713_v17 = vld [vmem:[#allocation2 + $0x570] sm:$0xff]  ;;  %v1551_v49 = vld [vmem:[#allocation2 + $0x60] sm:$0xff] }
 0x264   : > { %1909 = vmatpush.msra.mxu3 %v1599_v22  ;;  %1970 = vmatpush.msra.mxu0 %v1376_v41  ;;  %v1643_v9 = vld [vmem:[#allocation2 + $0x340] sm:$0xff] }
 0x266   : > { %1910 = vmatpush.msra.mxu3 %v1592_v52 }
 0x268   : > { %1911 = vmatpush.msra.mxu3 %v1585_v7  ;;  %v1222_v46 = vpop.permute.xlu2 %1221 }
 0x269   : > { %v3275_v0 = vpop.permute.xlu1 %1067  ;;  %v1318_v47 = vpop.permute.xlu0 %1317  ;;  %1243 = vst.msk [vmem:[#allocation2 + $0x490] sm:$0xff] %vm217_vm2, %v1222_v46 }
 0x26a   : > { %1912 = vmatpush.msra.mxu3 %v1578_v44  ;;  %v1079_v23 = vsel %vm1075_vm9, %v3233_v35, %v3275_v0  ;;  %v1326_v51 = vsel %vm1321_vm5, %v3174_v40, %v1318_v47  ;;  %v2407_v35 = vmov 0  }
 0x26b   : > { %1896 = vmatpush.msrb.mxu2 %v1079_v23  ;;  %1931 = vmatpush.msra.mxu1 %v1326_v51  ;;  %v1629_v23 = vld [vmem:[#allocation2 + $0x2d0] sm:$0xff] }
 0x26c   : > { %1913 = vmatpush.msra.mxu3 %v1571_v48  ;;  %2246 = vset.pattern.permute.xlu2 %v2407_v35  ;;  %v1615_v48 = vld [vmem:[#allocation2 + $0x260] sm:$0xff] }
 0x26d   : > { %1731 = vperm.xlu2 %2246, %v1728_v38   ;;  %2247 = vset.pattern.permute.xlu0 %v2407_v35 }
 0x26e   : > { %1914 = vmatpush.msra.mxu3 %v1564_v42 }
 0x270   : > { %1915 = vmatpush.msra.mxu3 %v1557_v50  ;;  %v3283_v58 = vpop.permute.xlu2 %1015  ;;  %v1685_v39 = vld [vmem:[#allocation2 + $0x490] sm:$0xff] }
 0x271   : > { %v1014_v56 = vpop.permute.xlu1 %1013  ;;  %v1269_v4 = vpop.permute.xlu0 %1268 }
 0x272   : > { %1916 = vmatpush.msra.mxu3 %v1550_v54  ;;  %v1025_v1 = vsel %vm1021_vm11, %v3244_v8, %v1014_v56  ;;  %v3289_v5 = vsel %vm1021_vm11, %v1014_v56, %v3283_v58  ;;  %v1277_v40 = vsel %vm1272_vm6, %v3193_v10, %v1269_v4  ;;  %v1635_v10 = vld [vmem:[#allocation2 + $0x300] sm:$0xff]  ;;  %v1608_v54 = vld [vmem:[#allocation2 + $0x228] sm:$0xff] }
 0x273   : > { %1897 = vmatpush.msrb.mxu2 %v1025_v1  ;;  %1932 = vmatpush.msra.mxu1 %v1277_v40  ;;  %v1594_v40 = vld [vmem:[#allocation2 + $0x1b8] sm:$0xff] }
 0x274   : > { %1917 = vmatpush.msra.mxu3 %v3251_v13  ;;  %2150 = vmatmul.msk.f32.vlgmr.msrb.gmra.mxu2 %vm1739_vm12, %v3188_v43 }
 0x275   : > { %1942 = vmatpush.msra.mxu2 %v1649_v11  ;;  %1918 = vmatmul.f32.vlgmr.msra.gmra.mxu3 %v3204_v15 }
 0x276   : > { %2007 = vmatpush.msrb.mxu3 %v1727_v62  ;;  %v1587_v62 = vld [vmem:[#allocation2 + $0x180] sm:$0xff] }
 0x277   : > { %1943 = vmatpush.msra.mxu2 %v1642_v12  ;;  %v1566_v12 = vld [vmem:[#allocation2 + $0xd8] sm:$0xff] }
 0x278   : > { %2008 = vmatpush.msrb.mxu3 %v1720_v14  ;;  %v1074_v61 = vpop.permute.xlu2 %1073  ;;  %v1573_v14 = vld [vmem:[#allocation2 + $0x110] sm:$0xff] }
 0x279   : > { %v1320_v21 = vpop.permute.xlu1 %1319  ;;  %1944 = vmatpush.msra.mxu2 %v1635_v10  ;;  %v1220_v3 = vpop.permute.xlu0 %1219  ;;  %v1545_v10 = vld [vmem:[#allocation2 + $0x30] sm:$0xff] }
 0x27a   : > { %2009 = vmatpush.msrb.mxu3 %v1713_v17  ;;  %v1327_v26 = vsel %vm1321_vm5, %v1318_v47, %v1320_v21  ;;  %1341 = vst.msk [vmem:[#allocation2 + $0x500] sm:$0xff] %vm217_vm2, %v1320_v21  ;;  %v1228_v33 = vsel %vm1223_vm8, %v3208_v57, %v1220_v3  ;;  %v1229_v60 = vsel %vm1223_vm8, %v1220_v3, %v1222_v46  ;;  %v1607_v57 = vld [vmem:[#allocation2 + $0x220] sm:$0xff]  ;;  %v1622_v47 = vld [vmem:[#allocation2 + $0x298] sm:$0xff] }
 0x27b   : > { %1945 = vmatpush.msra.mxu2 %v1628_v59  ;;  %1971 = vmatpush.msra.mxu0 %v1327_v26  ;;  %v1559_v17 = vld [vmem:[#allocation2 + $0xa0] sm:$0xff] }
 0x27c   : > { %2010 = vmatpush.msrb.mxu3 %v1706_v20  ;;  %1933 = vmatpush.msra.mxu1 %v1228_v33  ;;  %v1552_v20 = vld [vmem:[#allocation2 + $0x68] sm:$0xff] }
 0x27d   : > { %1946 = vmatpush.msra.mxu2 %v1621_v18 }
 0x27e   : > { %1934 = vmatpush.msra.mxu1 %v3267_v2  ;;  %v1558_v2 = vld [vmem:[#allocation2 + $0x98] sm:$0xff] }
 0x27f   : > { %1947 = vmatpush.msra.mxu2 %v1614_v53 }
 0x281   : > { %v1122_v36 = vpop.permute.xlu1 %1121  ;;  %1948 = vmatpush.msra.mxu2 %v1607_v57  ;;  %v1699_v34 = vld [vmem:[#allocation2 + $0x500] sm:$0xff]  ;;  %v1271_v27 = vpop.permute.xlu0 %1270 }
 0x282   : > { %v1130_v8 = vsel %vm1125_vm10, %v3263_v30, %v1122_v36  ;;  %2011 = vmatpush.msrb.mxu3 %v1699_v34  ;;  %v1278_v13 = vsel %vm1272_vm6, %v1269_v4, %v1271_v27  ;;  %1292 = vst.msk [vmem:[#allocation2 + $0x4c8] sm:$0xff] %vm217_vm2, %v1271_v27  ;;  %v1565_v30 = vld [vmem:[#allocation2 + $0xd0] sm:$0xff] }
 0x283   : > { %1949 = vmatpush.msra.mxu2 %v1600_v24  ;;  %1935 = vmatpush.msra.mxu1 %v1130_v8  ;;  %v1601_v4 = vld [vmem:[#allocation2 + $0x1f0] sm:$0xff] }
 0x284   : > { %1972 = vmatpush.msra.mxu0 %v1278_v13 }
 0x285   : > { %1950 = vmatpush.msra.mxu2 %v1593_v63 }
 0x286   : > { %1973 = vmatpush.msra.mxu0 %v1229_v60 }
 0x287   : > { %1951 = vmatpush.msra.mxu2 %v1586_v25 }
 0x289   : > { %v1173_v28 = vpop.permute.xlu1 %1172  ;;  %1952 = vmatpush.msra.mxu2 %v1579_v16  ;;  %v1070_v6 = vpop.permute.xlu0 %1069  ;;  %v1692_v37 = vld [vmem:[#allocation2 + $0x4c8] sm:$0xff] }
 0x28a   : > { %v1180_v29 = vsel %vm1174_vm7, %v3261_v19, %v1173_v28  ;;  %1194 = vst.msk [vmem:[#allocation2 + $0x458] sm:$0xff] %vm217_vm2, %v1173_v28  ;;  %v1080_v32 = vsel %vm1075_vm9, %v3275_v0, %v1070_v6  ;;  %2012 = vmatpush.msrb.mxu3 %v1692_v37  ;;  %v1650_v19 = vld [vmem:[#allocation2 + $0x378] sm:$0xff]  ;;  %v1636_v0 = vld [vmem:[#allocation2 + $0x308] sm:$0xff] }
 0x28b   : > { %1953 = vmatpush.msra.mxu2 %v1572_v31  ;;  %1974 = vmatpush.msra.mxu0 %v1180_v29 }
 0x28c   : > { %1936 = vmatpush.msra.mxu1 %v1080_v32  ;;  %2013 = vmatpush.msrb.mxu3 %v1685_v39 }
 0x28d   : > { %1954 = vmatpush.msra.mxu2 %v1565_v30 }
 0x28e   : > { %1937 = vmatpush.msra.mxu1 %v3289_v5 }
 0x28f   : > { %1955 = vmatpush.msra.mxu2 %v1558_v2  ;;  %2151 = vmatmul.msk.f32.vlgmr.msra.gmra.mxu1 %vm1739_vm12, %v3188_v43 }
 0x290   : > { %1982 = vmatpush.msrb.mxu1 %v1650_v19 }
 0x291   : > { %v1072_v22 = vpop.permute.xlu1 %1071  ;;  %1956 = vmatpush.msra.mxu2 %v1551_v49  ;;  %v1678_v41 = vld [vmem:[#allocation2 + $0x458] sm:$0xff]  ;;  %v1759_v26 = vpop.f32.mrf.mxu0 }
 0x292   : > { %v1081_v52 = vsel %vm1075_vm9, %v1070_v6, %v1072_v22  ;;  %v1124_v7 = vpop.permute.xlu0 %1123  ;;  %1983 = vmatpush.msrb.mxu1 %v1643_v9  ;;  %2014 = vmatpush.msrb.mxu3 %v1678_v41  ;;  %v1082_v46 = vsel %vm1075_vm9, %v1072_v22, %v1074_v61 }
 0x293   : > { %v1131_v44 = vsel %vm1125_vm10, %v1122_v36, %v1124_v7  ;;  %1957 = vmatpush.msra.mxu2 %v209_v45  ;;  %1145 = vst.msk [vmem:[#allocation2 + $0x420] sm:$0xff] %vm217_vm2, %v1124_v7 }
 0x294   : > { %1984 = vmatpush.msrb.mxu1 %v1636_v0  ;;  %1975 = vmatpush.msra.mxu0 %v1131_v44  ;;  %1096 = vst.msk [vmem:[#allocation2 + $0x3e8] sm:$0xff] %vm217_vm2, %v1082_v46 }
 0x295   : > { %1958 = vmatmul.f32.vlgmr.msra.gmra.mxu2 %v3204_v15 }
 0x296   : > { %1985 = vmatpush.msrb.mxu1 %v1629_v23  ;;  %1976 = vmatpush.msra.mxu0 %v1081_v52  ;;  %v1799_v21 = vpop.f32.mrf.mxu2 }
 0x298   : > { %1986 = vmatpush.msrb.mxu1 %v1622_v47 }
 0x299   : > { %v1020_v51 = vpop.permute.xlu1 %1019 }
 0x29a   : > { %v1018_v42 = vpop.permute.xlu0 %1017  ;;  %1987 = vmatpush.msrb.mxu1 %v1615_v48  ;;  %v1671_v1 = vld [vmem:[#allocation2 + $0x420] sm:$0xff] }
 0x29b   : > { %v1027_v50 = vsel %vm1021_vm11, %v3283_v58, %v1018_v42  ;;  %v1028_v56 = vsel %vm1021_vm11, %v1018_v42, %v1020_v51  ;;  %2015 = vmatpush.msrb.mxu3 %v1671_v1  ;;  %v1664_v5 = vld [vmem:[#allocation2 + $0x3e8] sm:$0xff] }
 0x29c   : > { %1988 = vmatpush.msrb.mxu1 %v1608_v54  ;;  %1977 = vmatpush.msra.mxu0 %v1027_v50  ;;  %1042 = vst.msk [vmem:[#allocation2 + $0x3b0] sm:$0xff] %vm217_vm2, %v1028_v56  ;;  %v1580_v58 = vld [vmem:[#allocation2 + $0x148] sm:$0xff]  ;;  %vm2031_vm2 = vcmask 1043456  }
 0x29d   : > { %2152 = vmatmul.msk.f32.vlgmr.msra.gmra.mxu0 %vm1739_vm12, %v3188_v43  ;;  %2016 = vmatpush.msrb.mxu3 %v1664_v5 }
 0x29e   : > { %1989 = vmatpush.msrb.mxu1 %v1601_v4 }
 0x2a0   : > { %1990 = vmatpush.msrb.mxu1 %v1594_v40 }
 0x2a2   : > { %1991 = vmatpush.msrb.mxu1 %v1587_v62 }
 0x2a3   : > { %v1657_v11 = vld [vmem:[#allocation2 + $0x3b0] sm:$0xff] }
 0x2a4   : > { %1992 = vmatpush.msrb.mxu1 %v1580_v58  ;;  %2017 = vmatpush.msrb.mxu3 %v1657_v11 }
 0x2a5   : > { %2153 = vmatmul.msk.f32.vlgmr.msrb.gmra.mxu3 %vm1739_vm12, %v3188_v43 }
 0x2a6   : > { %1993 = vmatpush.msrb.mxu1 %v1573_v14 }
 0x2a8   : > { %1994 = vmatpush.msrb.mxu1 %v1566_v12  ;;  %v1779_v33 = vpop.f32.mrf.mxu1 }
 0x2aa   : > { %1995 = vmatpush.msrb.mxu1 %v1559_v17 }
 0x2ab   : > { %v1819_v3 = vpop.f32.mrf.mxu3 }
 0x2ac   : > { %1996 = vmatpush.msrb.mxu1 %v1552_v20 }
 0x2ae   : > { %1997 = vmatpush.msrb.mxu1 %v1545_v10 }
 0x2af   : > { %1998 = vmatmul.f32.vlgmr.msrb.gmra.mxu1 %v3204_v15  ;;  %v1879_v15 = vpop.f32.mrf.mxu0 }
 0x2c7   : > { %v1732_v59 = vpop.permute.xlu2 %1731 }
 0x2c8   : > { %v1800_v60 = vadd.f32 %v1799_v21, %v1732_v59  ;;  %v1760_v18 = vadd.f32 %v1759_v26, %v1732_v59  ;;  %v1839_v53 = vpop.f32.mrf.mxu1  ;;  %v1880_v57 = vadd.f32 %v1879_v15, %v1732_v59 }
 0x2c9   : > { %v1840_v36 = vadd.f32 %v1839_v53, %v1732_v59 }
 0x2ca   : > { %v1820_v43 = vadd.f32 %v1819_v3, %v1800_v60  ;;  %v1780_v35 = vadd.f32 %v1779_v33, %v1760_v18 }
 0x2cc   : > { %v2028_v38 = vrot.slane %v1820_v43, 4 }
 0x2ce   : > { %v2032_v45 = vsel %vm2031_vm2, %v1780_v35, %v2028_v38 }
 0x2cf   : > { %2038 = vst [vmem:[%s3338_s5] sm:$0xff] %v2032_v45 }
 0x2d8   : > { %v1859_v34 = vpop.f32.mrf.mxu3 }
 0x2d9   : > { %v1860_v24 = vadd.f32 %v1859_v34, %v1840_v36 }
 0x2f7   : > { %v1899_v8 = vpop.f32.mrf.mxu2 }
 0x2f8   : > { %v1900_v27 = vadd.f32 %v1899_v8, %v1880_v57  ;;  %v1919_v25 = vpop.f32.mrf.mxu3 }
 0x2f9   : > { %v1920_v16 = vadd.f32 %v1919_v25, %v1732_v59 }
 0x2fa   : > { %v2029_v13 = vrot.slane %v1900_v27, 4 }
 0x2fc   : > { %v2033_v63 = vsel %vm2031_vm2, %v1860_v24, %v2029_v13 }
 0x2fd   : > { %2039 = vst [vmem:[%s3338_s5 + $0x8] sm:$0xff] %v2033_v63 }
 0x30c   : > { %v1939_v28 = vpop.f32.mrf.mxu1 }
 0x30d   : > { %v1940_v32 = vadd.f32 %v1939_v28, %v1920_v16 }
 0x318   : > { %v1959_v55 = vpop.f32.mrf.mxu2 }
 0x319   : > { %v1960_v29 = vadd.f32 %v1959_v55, %v1732_v59 }
 0x31a   : > { %v1979_v6 = vpop.f32.mrf.mxu0 }
 0x31b   : > { %v1980_v31 = vadd.f32 %v1979_v6, %v1960_v29 }
 0x31d   : > { %v2030_v37 = vrot.slane %v1980_v31, 4 }
 0x31f   : > { %v2034_v39 = vsel %vm2031_vm2, %v1940_v32, %v2030_v37 }
 0x320   : > { %2040 = vst [vmem:[%s3338_s5 + $0x10] sm:$0xff] %v2034_v39 }
 0x328   : > { %v2019_v2 = vpop.f32.mrf.mxu3 }
 0x32c   : > { %v1999_v30 = vpop.f32.mrf.mxu1 }
 0x32d   : > { %v2000_v19 = vadd.f32 %v1999_v30, %v1732_v59 }
 0x32f   : > { %v2020_v49 = vadd.f32 %v2019_v2, %v2000_v19 }
 0x331   : > { %2042 = vst.msk [vmem:[%s3338_s5 + $0x18] sm:$0xf] %vm2041_vm13, %v2020_v49 }
 0x332   : > { %2335 = shalt.err (!%p2332_p11)
}
 0x333   : > { %2168 = dma.vmem_to_hbm [thread:$0]  (%p2495_p7), %s2058_s23, 448, %s2060_s10, %s2044_s11  }
 0x334 PF: > { %s2071_s4 = sand.u32 1, %s2366_s12   ;;  %p3389_p12 = scmp.ge.s32.totalorder %s2378_s15, 2 }
 0x335   : > { %s2072_s27 = scalar_lea.sflag [#allocation5], %s2071_s4 }
 0x336   : > { %p2179_p13 = pnand %p3389_p12, %p2463_p6 }
 0x338   : > { %p2180_p0 = pneg %p2179_p13 }
 0x33a   : > { %2361 = dma.done.wait (%p2180_p0), %s2072_s27, 448  }
 0x33b   : > { %2363 = vsyncadd (%p2180_p0), %s2072_s27, 4294966848  ;;  %p17_p3 = scmp.ge.s32.totalorder %s2481_s26, 4   ;;  %s3390_s12 = smov %s2370_s13 }
 0x33c   : > { %s3391_s13 = smov %s2374_s14  ;;  %s3392_s14 = smov %s2491_s29 }
 0x33d   : > { %s3393_s15 = smov %s2481_s26  ;;  %19 = sbr.rel (!%p17_p3) target bundleno = 6 (0x6), region = 81 }
 0x342   :  { %2078 = vsyncpa [#allocation4], 1 }
 0x343   :  { %2080 = vsyncpa [#allocation4 + $0x1], 1 }
 0x344   :  { %2081 = vsyncpa [#allocation7], 1 }
 0x345   :  { %2082 = vsyncpa [#allocation5], 1 }
 0x346   :  { %2084 = vsyncpa [#allocation5 + $0x1], 1 }

</bundles_post_ra>
